<compile_context>
chip_gen: v7x
topology: tpu7x:2x2x1
jax: 0.10.0
libtpu: 0.0.40
codegen_flags: <defaults>
</compile_context>

<pallas_src>
import functools

import jax
import jax.numpy as jnp
import numpy as np
from jax.experimental import pallas as pl
from jax.experimental.pallas import tpu as pltpu

HIDDEN = 32
FEAT = 1536

NODE_TYPES = ("Author", "Literature", "Keyword")
# (src, rel, dst) edge types of the hetero graph.
EDGE_TYPES = (
    ("Author", "CO_AUTHORED", "Author"),          # rel 0  -> dst Author
    ("Author", "WRITES", "Literature"),           # rel 1  -> dst Literature
    ("Literature", "REV_WRITES", "Author"),       # rel 2  -> dst Author
    ("Literature", "HAS_KEYWORD", "Keyword"),     # rel 3  -> dst Keyword
    ("Keyword", "REV_HAS_KEYWORD", "Literature"), # rel 4  -> dst Literature
)
# relations feeding each dst type (order = concat order inside the kernel)
DST_RELS = {"Author": (0, 2), "Literature": (1, 4), "Keyword": (3,)}

_VMEM = pl.BlockSpec(memory_space=pltpu.MemorySpace.VMEM)


def _round_up(n, m):
    return ((n + m - 1) // m) * m


# ------------------------------------------------------------------ encoder kernel
# y[t] = x[t] @ W[t] + b[t]   for t in {Literature, Keyword}, tiled over (type, M, K)

def _encoder_kernel(x_ref, w_ref, b_ref, o_ref, acc_ref):
    k = pl.program_id(2)

    @pl.when(k == 0)
    def _():
        acc_ref[...] = jnp.zeros_like(acc_ref)

    acc_ref[...] += jnp.dot(x_ref[...], w_ref[...],
                            preferred_element_type=jnp.float32)

    @pl.when(k == pl.num_programs(2) - 1)
    def _():
        o_ref[...] = acc_ref[...] + b_ref[...]


def encoder_forward(enc_x, enc_w, enc_b, *, tile_m=256, tile_k=512):
    n_types, m_pad, feat = enc_x.shape
    tm = tile_m if m_pad % tile_m == 0 else m_pad
    tk = tile_k if feat % tile_k == 0 else feat
    grid = (n_types, m_pad // tm, feat // tk)
    return pl.pallas_call(
        _encoder_kernel,
        out_shape=jax.ShapeDtypeStruct((n_types, m_pad, HIDDEN), jnp.float32),
        grid_spec=pltpu.PrefetchScalarGridSpec(
            num_scalar_prefetch=0,
            grid=grid,
            in_specs=[
                pl.BlockSpec((None, tm, tk), lambda t, m, k: (t, m, k)),
                pl.BlockSpec((None, tk, HIDDEN), lambda t, m, k: (t, k, 0)),
                pl.BlockSpec((None, 1, HIDDEN), lambda t, m, k: (t, 0, 0)),
            ],
            out_specs=pl.BlockSpec((None, tm, HIDDEN), lambda t, m, k: (t, m, 0)),
            scratch_shapes=[pltpu.VMEM((tm, HIDDEN), jnp.float32)],
        ),
        compiler_params=pltpu.CompilerParams(
            dimension_semantics=("parallel", "parallel", "arbitrary"),
            vmem_limit_bytes=64 * 1024 * 1024,
        ),
    )(enc_x, enc_w, enc_b)


# ------------------------------------------------------------------ hetero-SAGE kernel
# Two hetero SAGEConv layers (sum aggregation across relations, mean over neighbors,
# PyG lin_l bias / lin_r no-bias).  Only the Author output of layer 2 is produced
# (the classifier never reads the other node types).

def _hetero_sage_kernel(
    x_a_ref, x_l_ref, x_k_ref,
    adj_aa_ref, adj_wl_ref, adj_rw_ref, adj_rhk_ref,
    w_a_ref, b_a_ref, w_l1_ref, b_l1_ref,
    out_ref,
):
    dotf = functools.partial(jnp.dot, preferred_element_type=jnp.float32)

    x_a = x_a_ref[...]
    x_l = x_l_ref[...]
    x_k = x_k_ref[...]
    adj_aa = adj_aa_ref[...]    # Author     <- Author      (CO_AUTHORED)      bf16
    adj_wl = adj_wl_ref[...]    # Literature <- Author      (WRITES)           bf16
    adj_rw = adj_rw_ref[...]    # Author     <- Literature  (REV_WRITES)       bf16
    adj_rhk = adj_rhk_ref[...]  # Literature <- Keyword     (REV_HAS_KEYWORD)  bf16

    # ---------------- layer 1 (+ relu): Author and Literature updates
    xa_b = x_a.astype(jnp.bfloat16)
    xl_b = x_l.astype(jnp.bfloat16)
    xk_b = x_k.astype(jnp.bfloat16)
    agg_aa = dotf(adj_aa, xa_b)     # mean-aggr, bf16 x bf16 -> f32 accumulate
    agg_rw = dotf(adj_rw, xl_b)
    agg_wl = dotf(adj_wl, xa_b)
    agg_rhk = dotf(adj_rhk, xk_b)
    # single K-concatenated GEMM per dst type: [aggr_r1 | aggr_r2 | x_dst] @ [96,32]
    h_a = dotf(jnp.concatenate([agg_aa, agg_rw, x_a], axis=-1), w_a_ref[0]) + b_a_ref[0]
    h_l = dotf(jnp.concatenate([agg_wl, agg_rhk, x_l], axis=-1), w_l1_ref[...]) + b_l1_ref[...]
    h_a = jnp.maximum(h_a, 0.0)
    h_l = jnp.maximum(h_l, 0.0)

    # ---------------- layer 2: Author rows only (only consumer is the classifier)
    ha_b = h_a.astype(jnp.bfloat16)
    hl_b = h_l.astype(jnp.bfloat16)
    agg_aa2 = dotf(adj_aa, ha_b)
    agg_rw2 = dotf(adj_rw, hl_b)
    out_ref[...] = dotf(jnp.concatenate([agg_aa2, agg_rw2, h_a], axis=-1),
                        w_a_ref[1]) + b_a_ref[1]


# ------------------------------------------------------------------ preprocessing

def build_norm_adj(edge_index, num_src, num_dst):
    # dense row-normalized adjacency A[dst, src]; mean aggregation, 0 for isolated nodes
    src, dst = edge_index[0], edge_index[1]
    adj = jnp.zeros((num_dst, num_src), jnp.float32).at[dst, src].add(1.0)
    deg = adj.sum(axis=1, keepdims=True)
    return adj / jnp.maximum(deg, 1.0)


def prepare_inputs(params, data):
    """Static per-graph preprocessing, run ONCE outside the jitted hot path.

    Pads node counts to multiples of 8, gathers author embeddings, builds bf16
    dense normalized adjacencies, stacks/pre-transposes bf16 encoder weights, and
    builds the K-concatenated per-dst GNN weights (root terms summed across
    relations — valid because to_hetero aggregates relations with 'sum').
    """
    n_auth = int(data["author_node_id"].shape[0])
    n_lit = int(data["lit_x"].shape[0])
    n_key = int(data["key_x"].shape[0])

    na = _round_up(n_auth, 8)
    nf = _round_up(max(n_lit, n_key), 8)   # shared padded row count for Linear-encoded types
    sizes = {"Author": na, "Literature": nf, "Keyword": nf}

    # Author embedding gather (glue) + zero row padding
    x_auth = params["author_emb"][data["author_node_id"]]
    x_auth = jnp.zeros((na, HIDDEN), jnp.float32).at[:n_auth].set(x_auth)

    # stacked, padded, bf16 features + pre-transposed bf16 weights for the encoder GEMM
    enc_x = jnp.zeros((2, nf, FEAT), jnp.float32)
    enc_x = enc_x.at[0, :n_lit].set(data["lit_x"])
    enc_x = enc_x.at[1, :n_key].set(data["key_x"])
    enc_x = enc_x.astype(jnp.bfloat16)
    enc_w = jnp.stack([params["lit_w"].T, params["key_w"].T]).astype(jnp.bfloat16)
    enc_b = jnp.stack([params["lit_b"].reshape(1, HIDDEN),
                       params["key_b"].reshape(1, HIDDEN)])

    def norm_adj(et):
        return build_norm_adj(data["edge_index"][et],
                              sizes[et[0]], sizes[et[2]]).astype(jnp.bfloat16)

    adj_aa = norm_adj(EDGE_TYPES[0])
    adj_wl = norm_adj(EDGE_TYPES[1])
    adj_rw = norm_adj(EDGE_TYPES[2])
    adj_rhk = norm_adj(EDGE_TYPES[4])
    # adj_hk (Keyword <- Literature) is dead for the returned prediction and is dropped.

    # K-concatenated per-dst weights: [Wl_r1^T ; Wl_r2^T ; (sum_r Wr_r)^T], summed biases
    def dst_weight(lp, dst):
        rels = [EDGE_TYPES[i] for i in DST_RELS[dst]]
        parts = [lp[et]["wl"].T for et in rels]
        parts.append(sum(lp[et]["wr"] for et in rels).T)
        w = jnp.concatenate(parts, axis=0).astype(jnp.float32)
        b = sum(lp[et]["bl"] for et in rels).reshape(1, HIDDEN).astype(jnp.float32)
        return w, b

    w_a1, b_a1 = dst_weight(params["conv1"], "Author")
    w_a2, b_a2 = dst_weight(params["conv2"], "Author")
    w_l1, b_l1 = dst_weight(params["conv1"], "Literature")

    return {
        "x_auth": x_auth,
        "enc_x": enc_x, "enc_w": enc_w, "enc_b": enc_b,
        "adj_aa": adj_aa, "adj_wl": adj_wl, "adj_rw": adj_rw, "adj_rhk": adj_rhk,
        "w_a": jnp.stack([w_a1, w_a2]), "b_a": jnp.stack([b_a1, b_a2]),
        "w_l1": w_l1, "b_l1": b_l1,
    }


# ------------------------------------------------------------------ jitted forward

@jax.jit
def model_forward(prep, edge_label_index):
    enc_out = encoder_forward(prep["enc_x"], prep["enc_w"], prep["enc_b"])
    x_l = enc_out[0]
    x_k = enc_out[1]

    na = prep["x_auth"].shape[0]
    x_a_final = pl.pallas_call(
        _hetero_sage_kernel,
        out_shape=jax.ShapeDtypeStruct((na, HIDDEN), jnp.float32),
        in_specs=[_VMEM] * 11,
        out_specs=_VMEM,
        compiler_params=pltpu.CompilerParams(vmem_limit_bytes=64 * 1024 * 1024),
    )(prep["x_auth"], x_l, x_k,
      prep["adj_aa"], prep["adj_wl"], prep["adj_rw"], prep["adj_rhk"],
      prep["w_a"], prep["b_a"], prep["w_l1"], prep["b_l1"])

    # classifier: gather the two endpoints of each label edge + per-edge dot product.
    a = x_a_final[edge_label_index[0]]
    b = x_a_final[edge_label_index[1]]
    return jnp.sum(a * b, axis=-1)


# ------------------------------------------------------------------ references

def reference_forward_fp32(params, data):
    """Straight f32 port of the PyTorch module (per-relation, no padding)."""
    x_dict = {
        "Author": params["author_emb"][data["author_node_id"]],
        "Literature": data["lit_x"] @ params["lit_w"].T + params["lit_b"],
        "Keyword": data["key_x"] @ params["key_w"].T + params["key_b"],
    }
    sizes = {nt: x_dict[nt].shape[0] for nt in NODE_TYPES}
    adjs = {et: build_norm_adj(data["edge_index"][et], sizes[et[0]], sizes[et[2]])
            for et in EDGE_TYPES}
    for lname, relu in (("conv1", True), ("conv2", False)):
        new = {}
        for dst in NODE_TYPES:
            acc = jnp.zeros((sizes[dst], HIDDEN), jnp.float32)
            for et in EDGE_TYPES:
                if et[2] != dst:
                    continue
                p = params[lname][et]
                aggr = adjs[et] @ x_dict[et[0]]
                acc = acc + aggr @ p["wl"].T + p["bl"] + x_dict[dst] @ p["wr"].T
            new[dst] = jnp.maximum(acc, 0.0) if relu else acc
        x_dict = new
    a = x_dict["Author"][data["edge_label_index"][0]]
    b = x_dict["Author"][data["edge_label_index"][1]]
    return (a * b).sum(-1)


def reference_forward_bf16(params, data):
    """Same math as the kernels' precision path (bf16 big operands, f32 accumulation),
    but per-relation / unpadded / uncollapsed — validates the algebraic rewrites and
    the Pallas lowering at matched precision."""
    bf16, f32 = jnp.bfloat16, jnp.float32
    dotf = functools.partial(jnp.dot, preferred_element_type=f32)
    x_dict = {
        "Author": params["author_emb"][data["author_node_id"]].astype(f32),
        "Literature": dotf(data["lit_x"].astype(bf16), params["lit_w"].T.astype(bf16))
                      + params["lit_b"],
        "Keyword": dotf(data["key_x"].astype(bf16), params["key_w"].T.astype(bf16))
                   + params["key_b"],
    }
    sizes = {nt: x_dict[nt].shape[0] for nt in NODE_TYPES}
    adjs = {et: build_norm_adj(data["edge_index"][et],
                               sizes[et[0]], sizes[et[2]]).astype(bf16)
            for et in EDGE_TYPES}
    for lname, relu in (("conv1", True), ("conv2", False)):
        new = {}
        for dst in NODE_TYPES:
            acc = jnp.zeros((sizes[dst], HIDDEN), f32)
            for et in EDGE_TYPES:
                if et[2] != dst:
                    continue
                p = params[lname][et]
                aggr = dotf(adjs[et], x_dict[et[0]].astype(bf16))
                acc = acc + dotf(aggr, p["wl"].T) + p["bl"] + dotf(x_dict[dst], p["wr"].T)
            new[dst] = jnp.maximum(acc, 0.0) if relu else acc
        x_dict = new
    a = x_dict["Author"][data["edge_label_index"][0]]
    b = x_dict["Author"][data["edge_label_index"][1]]
    return (a * b).sum(-1)


# ------------------------------------------------------------------ setup

def init_params(key, num_authors):
    params = {}
    k = iter(jax.random.split(key, 64))
    params["author_emb"] = jax.random.normal(next(k), (num_authors, HIDDEN), jnp.float32)
    params["lit_w"] = jax.random.normal(next(k), (HIDDEN, FEAT), jnp.float32) * 0.02
    params["lit_b"] = jax.random.normal(next(k), (HIDDEN,), jnp.float32) * 0.02
    params["key_w"] = jax.random.normal(next(k), (HIDDEN, FEAT), jnp.float32) * 0.02
    params["key_b"] = jax.random.normal(next(k), (HIDDEN,), jnp.float32) * 0.02
    for lname in ("conv1", "conv2"):
        layer = {}
        for et in EDGE_TYPES:
            layer[et] = {
                "wl": jax.random.normal(next(k), (HIDDEN, HIDDEN), jnp.float32) * 0.1,
                "wr": jax.random.normal(next(k), (HIDDEN, HIDDEN), jnp.float32) * 0.1,
                "bl": jax.random.normal(next(k), (HIDDEN,), jnp.float32) * 0.1,
            }
        params[lname] = layer
    return params


def make_data(key):
    num_authors, num_lit, num_key = 16, 12, 10
    sizes = {"Author": num_authors, "Literature": num_lit, "Keyword": num_key}
    n_edges = {
        ("Author", "CO_AUTHORED", "Author"): 24,
        ("Author", "WRITES", "Literature"): 20,
        ("Literature", "REV_WRITES", "Author"): 20,
        ("Literature", "HAS_KEYWORD", "Keyword"): 18,
        ("Keyword", "REV_HAS_KEYWORD", "Literature"): 18,
    }
    ks = iter(jax.random.split(key, 16))
    edge_index = {}
    for et in EDGE_TYPES:
        src = jax.random.randint(next(ks), (n_edges[et],), 0, sizes[et[0]], jnp.int32)
        dst = jax.random.randint(next(ks), (n_edges[et],), 0, sizes[et[2]], jnp.int32)
        edge_index[et] = jnp.stack([src, dst])
    data = {
        "author_node_id": jnp.arange(num_authors, dtype=jnp.int32),
        "lit_x": jax.random.normal(next(ks), (num_lit, FEAT), jnp.float32),
        "key_x": jax.random.normal(next(ks), (num_key, FEAT), jnp.float32),
        "edge_index": edge_index,
        "edge_label_index": jax.random.randint(next(ks), (2, 8), 0, num_authors, jnp.int32),
    }
    return data, num_authors


if __name__ == "__main__":
    key = jax.random.PRNGKey(0)
    k_data, k_param = jax.random.split(key)
    data, num_authors = make_data(k_data)
    params = init_params(k_param, num_authors)

    # one-time preprocessing (padding, adjacencies, transposes, collapsed weights, bf16 casts)
    prep = jax.tree_util.tree_map(jax.block_until_ready, prepare_inputs(params, data))
    eli = data["edge_label_index"]

    pred = jax.block_until_ready(model_forward(prep, eli))

    ref_bf16 = jax.block_until_ready(reference_forward_bf16(params, data))
    ref_fp32 = jax.block_until_ready(reference_forward_fp32(params, data))

    assert pred.shape == (eli.shape[1],)
    # tight check vs a precision-matched reference (validates lowering + rewrites)
    np.testing.assert_allclose(np.asarray(pred), np.asarray(ref_bf16), rtol=1e-2, atol=1e-2)
    # loose semantic check vs the full-f32 reference (bf16 DMA operands induce ~1% error)
    np.testing.assert_allclose(np.asarray(pred), np.asarray(ref_fp32), rtol=1e-1, atol=1e-1)
    print("KERNEL_OK")
</pallas_src>

<mosaic_0001>
module attributes {stable_mosaic.version = 11 : i64} {
  func.func @_encoder_kernel(%arg0: i32, %arg1: i32, %arg2: i32, %arg3: memref<1x16x512xbf16, #tpu.memory_space<vmem>>, %arg4: memref<1x512x32xbf16, #tpu.memory_space<vmem>>, %arg5: memref<1x1x32xf32, #tpu.memory_space<vmem>>, %arg6: memref<1x16x32xf32, #tpu.memory_space<vmem>>, %arg7: memref<16x32xf32, #tpu.memory_space<vmem>>) attributes {dimension_semantics = [#tpu.dimension_semantics<parallel>, #tpu.dimension_semantics<parallel>, #tpu.dimension_semantics<arbitrary>], iteration_bounds = array<i64: 2, 1, 3>, scalar_prefetch = 0 : i64, scratch_operands = 1 : i64, tpu.core_type = #tpu.core_type<tc>, window_params = [{transform_indices = @transform_0, window_bounds = array<i64: 1, 16, 512>}, {transform_indices = @transform_1, window_bounds = array<i64: 1, 512, 32>}, {transform_indices = @transform_2, window_bounds = array<i64: 1, 1, 32>}, {transform_indices = @transform_3, window_bounds = array<i64: 1, 16, 32>}]} {
    %c0_i32 = arith.constant 0 : i32
    %0 = arith.cmpi eq, %arg2, %c0_i32 : i32
    %1 = arith.extui %0 : i1 to i32
    %c0_i32_0 = arith.constant 0 : i32
    %2 = arith.cmpi ne, %1, %c0_i32_0 : i32
    scf.if %2 {
      %cst_11 = arith.constant 0.000000e+00 : f32
      %14 = vector.broadcast %cst_11 : f32 to vector<16x32xf32>
      %c0_12 = arith.constant 0 : index
      %c0_13 = arith.constant 0 : index
      %15 = vector.load %arg7[%c0_12, %c0_13] : memref<16x32xf32, #tpu.memory_space<vmem>>, vector<16x32xf32>
      tpu.vector_store %arg7[%c0_12, %c0_13], %14 {strides = array<i32>} : memref<16x32xf32, #tpu.memory_space<vmem>>, vector<16x32xf32>,
    } else {
    }
    %c0 = arith.constant 0 : index
    %c0_1 = arith.constant 0 : index
    %3 = vector.load %arg7[%c0, %c0_1] : memref<16x32xf32, #tpu.memory_space<vmem>>, vector<16x32xf32>
    %c0_2 = arith.constant 0 : index
    %c0_3 = arith.constant 0 : index
    %c0_4 = arith.constant 0 : index
    %4 = vector.load %arg3[%c0_2, %c0_3, %c0_4] : memref<1x16x512xbf16, #tpu.memory_space<vmem>>, vector<1x16x512xbf16>
    %5 = vector.shape_cast %4 : vector<1x16x512xbf16> to vector<16x512xbf16>
    %c0_5 = arith.constant 0 : index
    %c0_6 = arith.constant 0 : index
    %c0_7 = arith.constant 0 : index
    %6 = vector.load %arg4[%c0_5, %c0_6, %c0_7] : memref<1x512x32xbf16, #tpu.memory_space<vmem>>, vector<1x512x32xbf16>
    %7 = vector.shape_cast %6 : vector<1x512x32xbf16> to vector<512x32xbf16>
    %cst = arith.constant dense<0.000000e+00> : vector<16x32xf32>
    %8 = tpu.matmul %5, %7, %cst {dimension_numbers = #tpu.dot_dimension_numbers<[1], [0], [0], [1], [0, 0, 1, 1], [], []>} : vector<16x512xbf16>, vector<512x32xbf16>, vector<16x32xf32> -> vector<16x32xf32>
    %9 = arith.addf %3, %8 : vector<16x32xf32>
    %c0_8 = arith.constant 0 : index
    %c0_9 = arith.constant 0 : index
    %10 = vector.load %arg7[%c0_8, %c0_9] : memref<16x32xf32, #tpu.memory_space<vmem>>, vector<16x32xf32>
    tpu.vector_store %arg7[%c0_8, %c0_9], %9 {strides = array<i32>} : memref<16x32xf32, #tpu.memory_space<vmem>>, vector<16x32xf32>,
    %c2_i32 = arith.constant 2 : i32
    %11 = arith.cmpi eq, %arg2, %c2_i32 : i32
    %12 = arith.extui %11 : i1 to i32
    %c0_i32_10 = arith.constant 0 : i32
    %13 = arith.cmpi ne, %12, %c0_i32_10 : i32
    scf.if %13 {
      %c0_11 = arith.constant 0 : index
      %c0_12 = arith.constant 0 : index
      %14 = vector.load %arg7[%c0_11, %c0_12] : memref<16x32xf32, #tpu.memory_space<vmem>>, vector<16x32xf32>
      %c0_13 = arith.constant 0 : index
      %c0_14 = arith.constant 0 : index
      %c0_15 = arith.constant 0 : index
      %15 = vector.load %arg5[%c0_13, %c0_14, %c0_15] : memref<1x1x32xf32, #tpu.memory_space<vmem>>, vector<1x1x32xf32>
      %16 = vector.shape_cast %15 : vector<1x1x32xf32> to vector<1x32xf32>
      %17 = vector.broadcast %16 : vector<1x32xf32> to vector<16x32xf32>
      %18 = arith.addf %14, %17 : vector<16x32xf32>
      %c0_16 = arith.constant 0 : index
      %c0_17 = arith.constant 0 : index
      %c0_18 = arith.constant 0 : index
      %19 = vector.load %arg6[%c0_16, %c0_17, %c0_18] : memref<1x16x32xf32, #tpu.memory_space<vmem>>, vector<1x16x32xf32>
      %20 = vector.shape_cast %19 : vector<1x16x32xf32> to vector<16x32xf32>
      %21 = vector.shape_cast %18 : vector<16x32xf32> to vector<1x16x32xf32>
      tpu.vector_store %arg6[%c0_16, %c0_17, %c0_18], %21 {strides = array<i32>} : memref<1x16x32xf32, #tpu.memory_space<vmem>>, vector<1x16x32xf32>,
    } else {
    }
    return
  }
  func.func @transform_0(%arg0: i32, %arg1: i32, %arg2: i32) -> (i32, i32, i32) {
    %c0_i32 = arith.constant 0 : i32
    return %arg0, %arg1, %arg2 : i32, i32, i32
  }
  func.func @transform_1(%arg0: i32, %arg1: i32, %arg2: i32) -> (i32, i32, i32) {
    %c0_i32 = arith.constant 0 : i32
    %c0_i32_0 = arith.constant 0 : i32
    return %arg0, %arg2, %c0_i32 : i32, i32, i32
  }
  func.func @transform_2(%arg0: i32, %arg1: i32, %arg2: i32) -> (i32, i32, i32) {
    %c0_i32 = arith.constant 0 : i32
    %c0_i32_0 = arith.constant 0 : i32
    %c0_i32_1 = arith.constant 0 : i32
    return %arg0, %c0_i32, %c0_i32_0 : i32, i32, i32
  }
  func.func @transform_3(%arg0: i32, %arg1: i32, %arg2: i32) -> (i32, i32, i32) {
    %c0_i32 = arith.constant 0 : i32
    %c0_i32_0 = arith.constant 0 : i32
    return %arg0, %arg1, %c0_i32 : i32, i32, i32
  }
}

module attributes {stable_mosaic.version = 11 : i64} {
  func.func @_hetero_sage_kernel(%arg0: memref<16x32xf32, #tpu.memory_space<vmem>>, %arg1: memref<16x32xf32, #tpu.memory_space<vmem>>, %arg2: memref<16x32xf32, #tpu.memory_space<vmem>>, %arg3: memref<16x16xbf16, #tpu.memory_space<vmem>>, %arg4: memref<16x16xbf16, #tpu.memory_space<vmem>>, %arg5: memref<16x16xbf16, #tpu.memory_space<vmem>>, %arg6: memref<16x16xbf16, #tpu.memory_space<vmem>>, %arg7: memref<2x96x32xf32, #tpu.memory_space<vmem>>, %arg8: memref<2x1x32xf32, #tpu.memory_space<vmem>>, %arg9: memref<96x32xf32, #tpu.memory_space<vmem>>, %arg10: memref<1x32xf32, #tpu.memory_space<vmem>>, %arg11: memref<16x32xf32, #tpu.memory_space<vmem>>) attributes {dimension_semantics = [], scalar_prefetch = 0 : i64, scratch_operands = 0 : i64, tpu.core_type = #tpu.core_type<tc>} {
    %c0 = arith.constant 0 : index
    %c0_0 = arith.constant 0 : index
    %0 = vector.load %arg0[%c0, %c0_0] : memref<16x32xf32, #tpu.memory_space<vmem>>, vector<16x32xf32>
    %c0_1 = arith.constant 0 : index
    %c0_2 = arith.constant 0 : index
    %1 = vector.load %arg1[%c0_1, %c0_2] : memref<16x32xf32, #tpu.memory_space<vmem>>, vector<16x32xf32>
    %c0_3 = arith.constant 0 : index
    %c0_4 = arith.constant 0 : index
    %2 = vector.load %arg2[%c0_3, %c0_4] : memref<16x32xf32, #tpu.memory_space<vmem>>, vector<16x32xf32>
    %c0_5 = arith.constant 0 : index
    %c0_6 = arith.constant 0 : index
    %3 = vector.load %arg3[%c0_5, %c0_6] : memref<16x16xbf16, #tpu.memory_space<vmem>>, vector<16x16xbf16>
    %c0_7 = arith.constant 0 : index
    %c0_8 = arith.constant 0 : index
    %4 = vector.load %arg4[%c0_7, %c0_8] : memref<16x16xbf16, #tpu.memory_space<vmem>>, vector<16x16xbf16>
    %c0_9 = arith.constant 0 : index
    %c0_10 = arith.constant 0 : index
    %5 = vector.load %arg5[%c0_9, %c0_10] : memref<16x16xbf16, #tpu.memory_space<vmem>>, vector<16x16xbf16>
    %c0_11 = arith.constant 0 : index
    %c0_12 = arith.constant 0 : index
    %6 = vector.load %arg6[%c0_11, %c0_12] : memref<16x16xbf16, #tpu.memory_space<vmem>>, vector<16x16xbf16>
    %7 = arith.truncf %0 : vector<16x32xf32> to vector<16x32xbf16>
    %8 = arith.truncf %1 : vector<16x32xf32> to vector<16x32xbf16>
    %9 = arith.truncf %2 : vector<16x32xf32> to vector<16x32xbf16>
    %cst = arith.constant dense<0.000000e+00> : vector<16x32xf32>
    %10 = tpu.matmul %3, %7, %cst {dimension_numbers = #tpu.dot_dimension_numbers<[1], [0], [0], [1], [0, 0, 1, 1], [], []>} : vector<16x16xbf16>, vector<16x32xbf16>, vector<16x32xf32> -> vector<16x32xf32>
    %cst_13 = arith.constant dense<0.000000e+00> : vector<16x32xf32>
    %11 = tpu.matmul %5, %8, %cst_13 {dimension_numbers = #tpu.dot_dimension_numbers<[1], [0], [0], [1], [0, 0, 1, 1], [], []>} : vector<16x16xbf16>, vector<16x32xbf16>, vector<16x32xf32> -> vector<16x32xf32>
    %cst_14 = arith.constant dense<0.000000e+00> : vector<16x32xf32>
    %12 = tpu.matmul %4, %7, %cst_14 {dimension_numbers = #tpu.dot_dimension_numbers<[1], [0], [0], [1], [0, 0, 1, 1], [], []>} : vector<16x16xbf16>, vector<16x32xbf16>, vector<16x32xf32> -> vector<16x32xf32>
    %cst_15 = arith.constant dense<0.000000e+00> : vector<16x32xf32>
    %13 = tpu.matmul %6, %9, %cst_15 {dimension_numbers = #tpu.dot_dimension_numbers<[1], [0], [0], [1], [0, 0, 1, 1], [], []>} : vector<16x16xbf16>, vector<16x32xbf16>, vector<16x32xf32> -> vector<16x32xf32>
    %14 = tpu.concatenate %10, %11, %0 in 1 : vector<16x32xf32>, vector<16x32xf32>, vector<16x32xf32> -> vector<16x96xf32>
    %c0_16 = arith.constant 0 : index
    %c0_17 = arith.constant 0 : index
    %c0_18 = arith.constant 0 : index
    %15 = vector.load %arg7[%c0_16, %c0_17, %c0_18] : memref<2x96x32xf32, #tpu.memory_space<vmem>>, vector<1x96x32xf32>
    %16 = vector.shape_cast %15 : vector<1x96x32xf32> to vector<96x32xf32>
    %cst_19 = arith.constant dense<0.000000e+00> : vector<16x32xf32>
    %17 = tpu.matmul %14, %16, %cst_19 {dimension_numbers = #tpu.dot_dimension_numbers<[1], [0], [0], [1], [0, 0, 1, 1], [], []>} : vector<16x96xf32>, vector<96x32xf32>, vector<16x32xf32> -> vector<16x32xf32>
    %c0_20 = arith.constant 0 : index
    %c0_21 = arith.constant 0 : index
    %c0_22 = arith.constant 0 : index
    %18 = vector.load %arg8[%c0_20, %c0_21, %c0_22] : memref<2x1x32xf32, #tpu.memory_space<vmem>>, vector<1x1x32xf32>
    %19 = vector.shape_cast %18 : vector<1x1x32xf32> to vector<1x32xf32>
    %20 = vector.broadcast %19 : vector<1x32xf32> to vector<16x32xf32>
    %21 = arith.addf %17, %20 : vector<16x32xf32>
    %22 = tpu.concatenate %12, %13, %1 in 1 : vector<16x32xf32>, vector<16x32xf32>, vector<16x32xf32> -> vector<16x96xf32>
    %c0_23 = arith.constant 0 : index
    %c0_24 = arith.constant 0 : index
    %23 = vector.load %arg9[%c0_23, %c0_24] : memref<96x32xf32, #tpu.memory_space<vmem>>, vector<96x32xf32>
    %cst_25 = arith.constant dense<0.000000e+00> : vector<16x32xf32>
    %24 = tpu.matmul %22, %23, %cst_25 {dimension_numbers = #tpu.dot_dimension_numbers<[1], [0], [0], [1], [0, 0, 1, 1], [], []>} : vector<16x96xf32>, vector<96x32xf32>, vector<16x32xf32> -> vector<16x32xf32>
    %c0_26 = arith.constant 0 : index
    %c0_27 = arith.constant 0 : index
    %25 = vector.load %arg10[%c0_26, %c0_27] : memref<1x32xf32, #tpu.memory_space<vmem>>, vector<1x32xf32>
    %26 = vector.broadcast %25 : vector<1x32xf32> to vector<16x32xf32>
    %27 = arith.addf %24, %26 : vector<16x32xf32>
    %cst_28 = arith.constant 0.000000e+00 : f32
    %28 = vector.broadcast %cst_28 : f32 to vector<16x32xf32>
    %29 = arith.maximumf %21, %28 : vector<16x32xf32>
    %cst_29 = arith.constant 0.000000e+00 : f32
    %30 = vector.broadcast %cst_29 : f32 to vector<16x32xf32>
    %31 = arith.maximumf %27, %30 : vector<16x32xf32>
    %32 = arith.truncf %29 : vector<16x32xf32> to vector<16x32xbf16>
    %33 = arith.truncf %31 : vector<16x32xf32> to vector<16x32xbf16>
    %cst_30 = arith.constant dense<0.000000e+00> : vector<16x32xf32>
    %34 = tpu.matmul %3, %32, %cst_30 {dimension_numbers = #tpu.dot_dimension_numbers<[1], [0], [0], [1], [0, 0, 1, 1], [], []>} : vector<16x16xbf16>, vector<16x32xbf16>, vector<16x32xf32> -> vector<16x32xf32>
    %cst_31 = arith.constant dense<0.000000e+00> : vector<16x32xf32>
    %35 = tpu.matmul %5, %33, %cst_31 {dimension_numbers = #tpu.dot_dimension_numbers<[1], [0], [0], [1], [0, 0, 1, 1], [], []>} : vector<16x16xbf16>, vector<16x32xbf16>, vector<16x32xf32> -> vector<16x32xf32>
    %36 = tpu.concatenate %34, %35, %29 in 1 : vector<16x32xf32>, vector<16x32xf32>, vector<16x32xf32> -> vector<16x96xf32>
    %c1 = arith.constant 1 : index
    %c0_32 = arith.constant 0 : index
    %c0_33 = arith.constant 0 : index
    %37 = vector.load %arg7[%c1, %c0_32, %c0_33] : memref<2x96x32xf32, #tpu.memory_space<vmem>>, vector<1x96x32xf32>
    %38 = vector.shape_cast %37 : vector<1x96x32xf32> to vector<96x32xf32>
    %cst_34 = arith.constant dense<0.000000e+00> : vector<16x32xf32>
    %39 = tpu.matmul %36, %38, %cst_34 {dimension_numbers = #tpu.dot_dimension_numbers<[1], [0], [0], [1], [0, 0, 1, 1], [], []>} : vector<16x96xf32>, vector<96x32xf32>, vector<16x32xf32> -> vector<16x32xf32>
    %c1_35 = arith.constant 1 : index
    %c0_36 = arith.constant 0 : index
    %c0_37 = arith.constant 0 : index
    %40 = vector.load %arg8[%c1_35, %c0_36, %c0_37] : memref<2x1x32xf32, #tpu.memory_space<vmem>>, vector<1x1x32xf32>
    %41 = vector.shape_cast %40 : vector<1x1x32xf32> to vector<1x32xf32>
    %42 = vector.broadcast %41 : vector<1x32xf32> to vector<16x32xf32>
    %43 = arith.addf %39, %42 : vector<16x32xf32>
    %c0_38 = arith.constant 0 : index
    %c0_39 = arith.constant 0 : index
    %44 = vector.load %arg11[%c0_38, %c0_39] : memref<16x32xf32, #tpu.memory_space<vmem>>, vector<16x32xf32>
    tpu.vector_store %arg11[%c0_38, %c0_39], %43 {strides = array<i32>} : memref<16x32xf32, #tpu.memory_space<vmem>>, vector<16x32xf32>,
    return
  }
}

</mosaic_0001>

<bundles_post_ra>
// kernel: model_forward.2
= control target key start
LH: loop header
LB: loop body
LE: loop exit
PB: predicated region body
PF: predicated region fallthrough
CT: control target
= control target key end

     0   :  { %s1759_s0 = inlined_call_operand.hbm [shape: bf16[2,16,1536], index: 0, kind: input, shape index: {}]   ;;  %s1760_s1 = inlined_call_operand.hbm [shape: bf16[2,1536,32], index: 1, kind: input, shape index: {}]   ;;  %s1761_s2 = inlined_call_operand.hbm [shape: f32[2,1,32], index: 2, kind: input, shape index: {}]   ;;  %s1762_s3 = inlined_call_operand.hbm [shape: f32[2,16,32], index: 3, kind: output, shape index: {}]  }
   0x1   :  { %1771 = sst [smem:[#allocation18_spill]] %s1760_s1 }
   0x2   :  { %1772 = sst [smem:[#allocation19_spill]] %s1762_s3 }
   0x3   :  { %8 = vsyncpa [#allocation4], 0 }
   0x4   :  { %10 = vsyncpa [#allocation4 + $0x1], 0 }
   0x5   :  { %11 = vsyncpa [#allocation7], 0 }
   0x6   :  { %13 = vsyncpa [#allocation7 + $0x1], 0 }
   0x7   :  { %14 = vsyncpa [#allocation5], 0 }
   0x8   :  { %16 = vsyncpa [#allocation5 + $0x1], 0  ;;  %s1364_s12 = smov 0   ;;  %s1366_s13 = smov 0  }
   0x9   :  { %s1368_s14 = smov 0   ;;  %s1370_s15 = smov 0  }
   0xa   :  { %s1372_s16 = smov 0   ;;  %s1374_s17 = smov 0  }
   0xb   :  { %s1376_s18 = smov 0   ;;  %s1378_s19 = smov 0  }
   0xc   :  { %s1380_s20 = smov 0   ;;  %s1382_s21 = smov 0  }
   0xd   :  { %s1384_s22 = smov 0  }
   0xe LB: > { %1773 = sst [smem:[#allocation14_spill]] %s1318_s19  ;;  %s34_s23 = sadd.s32 1, %s1322_s20  ;;  %s1330_s22 = sphi %s1384_s22, %s22_s22   ;;  %s1326_s21 = sphi %s1382_s21, %s1807_s21   ;;  %s1322_s20 = sphi %s1380_s20, %s1806_s20   ;;  %s1318_s19 = sphi %s1378_s19, %s1805_s19   ;;  %s1314_s18 = sphi %s1376_s18, %s1804_s18   ;;  %s1310_s17 = sphi %s1374_s17, %s1803_s17   ;;  %s1306_s16 = sphi %s1372_s16, %s1802_s16   ;;  %s1302_s15 = sphi %s1370_s15, %s1801_s15   ;;  %s1298_s14 = sphi %s1368_s14, %s1800_s14   ;;  %s1294_s13 = sphi %s1366_s13, %s1799_s13   ;;  %s1290_s12 = sphi %s1364_s12, %s1798_s12  }
   0xf   : > { %s41_s24 = sadd.s32 1, %s1326_s21  ;;  %p35_p0 = scmp.ge.s32.totalorder %s34_s23, 3 }
  0x10   : > { %s52_s25 = sadd.s32 1, %s1310_s17  ;;  %p59_p1 = scmp.ne.s32.totalorder %s1310_s17, %s1306_s16 }
  0x11   : > { %p1767_p2 = scmp.eq.s32.totalorder %s1330_s22, 0  ;;  %s1809_s23 = smov (%p35_p0, %s34_s23), 0 }
  0x12   : > { %1774 = sst [smem:[#allocation15_spill]] %s1809_s23  ;;  %s1811_s24 = smov (!%p35_p0, %s41_s24), %s1326_s21 }
  0x13   : > { %s48_s26 = ssub.s32 %s1322_s20, %s1809_s23  ;;  %p61_p3 = por %p1767_p2, %p59_p1 }
  0x14   : > { %p43_p4 = scmp.ge.s32.totalorder %s1811_s24, 2  ;;  %p1766_p6 = scmp.lt.s32.totalorder %s1330_s22, 6 }
  0x15   : > { %s1438_s27 = sand.u32 1, %s1310_s17   ;;  %s197_s30 = sand.u32 1, %s1330_s22  }
  0x16   : > { %s1813_s24 = smov (%p43_p4, %s1811_s24), 0  ;;  %p1442_p7 = pnand %p1766_p6, %p61_p3 }
  0x17   : > { %1775 = sst [smem:[#allocation16_spill]] %s1813_s24  ;;  %s1448_s29 = ssub.s32 %s1326_s21, %s1813_s24 }
  0x18   : > { %s49_s4 = sor.u32 %s48_s26, %s1448_s29  ;;  %s853_s5 = sshll.u32 %s1438_s27, 8 }
  0x19   : > { %p50_p8 = scmp.eq.s32.totalorder %s49_s4, 0  ;;  %s854_s6 = sshll.u32 %s1322_s20, 6 }
  0x1a   : > { %s951_s8 = smul.u32 192, %s1326_s21  ;;  %s201_s9 = scalar_lea.vmem [#allocation6], %s853_s5 }
  0x1b   : > { %s1455_s7 = scalar_select %p50_p8, %s1310_s17, %s52_s25  }
  0x1c   : > { %s210_s10 = sshll.u32 %s201_s9, 4  ;;  %s207_s11 = sadd.s32 %s951_s8, %s854_s6  ;;  %s1458_s10 = int_to_ptr.vmem [resolvable:$true] %s210_s10 }
  0x1d   : > { %1777 = sst [smem:[#allocation17_spill]] %s1455_s7  ;;  %s855_s23 = sshll.u32 %s207_s11, 6 }
  0x1e   : > { %s1778_s1 = sld [smem:[#allocation18_spill]]  ;;  %p857_p9 = scmp.ge.s32.totalorder %s1330_s22, 1 }
  0x1f   : > { %s1466_s26 = scalar_lea.sflag [#allocation7], %s197_s30  ;;  %p1112_p11 = pneg %p1442_p7 }
  0x24   : > { %s1463_s19 = scalar_lea.hbm %s1778_s1, %s855_s23  ;;  %s1115_s3 = scalar_lea.hbm %s1778_s1, 24576 }
  0x25   : > { %s1110_s25 = scalar_lea.hbm %s1463_s19, 4096  ;;  %p1116_p0 = scmp.lt.u32.totalorder %s1463_s19, %s1778_s1 }
  0x26   : > { %p1111_p10 = scmp.ne.s32.totalorder %s1463_s19, %s1110_s25  ;;  %p1117_p1 = scmp.lt.u32.totalorder %s1115_s3, %s1110_s25 }
  0x27   : > { %p1119_p4 = scmp.lt.u32.totalorder %s1110_s25, %s1463_s19 }
  0x28   : > { %p1113_p12 = pnand %p1112_p11, %p1111_p10  ;;  %p1118_p3 = por %p1117_p1, %p1116_p0 }
  0x2a   : > { %p1114_p13 = pneg %p1113_p12  ;;  %p1120_p8 = por %p1119_p4, %p1118_p3 }
  0x2c   : > { %p1121_p6 = pnand %p1120_p8, %p1114_p13 }
  0x2e   : > { %1124 = shalt.err (!%p1121_p6)
}
  0x2f   : > { %s1125_s30 = scalar_lea.vmem %s1458_s10, 4096  ;;  %s1332_s6 = smov [#allocation6]  }
  0x30   : > { %p1126_p10 = scmp.ne.s32.totalorder %s1458_s10, %s1125_s30  ;;  %s1130_s8 = sshll.u32 %s1332_s6, 4  ;;  %s1131_s8 = int_to_ptr.vmem [resolvable:$false] %s1130_s8 }
  0x31   : > { %s1132_s9 = scalar_lea.vmem %s1131_s8, 8192  ;;  %p1133_p5 = scmp.lt.s32.totalorder %s1458_s10, %s1131_s8 }
  0x32   : > { %p1128_p12 = pnand %p1126_p10, %p1112_p11  ;;  %p1134_p0 = scmp.lt.s32.totalorder %s1132_s9, %s1125_s30 }
  0x34   : > { %p1129_p2 = pneg %p1128_p12  ;;  %p1135_p1 = por %p1134_p0, %p1133_p5 }
  0x36   : > { %p1136_p3 = pnand %p1135_p1, %p1129_p2 }
  0x38   : > { %1139 = shalt.err (!%p1136_p3)
}
  0x39   : > { %s1333_s11 = smov 64   ;;  %s1334_s25 = smov 4  }
  0x3a   : > { %966 = dma.hbm_to_vmem [thread:$0]  (!%p1442_p7), %s1463_s19, 4096, %s1458_s10, %s1466_s26, %s1333_s11, %s1333_s11, %s1334_s25  }
  0x3b   : > { %p235_p6 = scmp.lt.s32.totalorder %s1330_s22, 7  ;;  %s850_s5 = sshll.u32 %s1438_s27, 5 }
  0x3c   : > { %s851_s3 = sshll.u32 %s1322_s20, 2  ;;  %s950_s23 = smul.u32 24, %s1326_s21 }
  0x3d   : > { %p1497_p5 = pnand %p857_p9, %p235_p6  ;;  %s175_s24 = scalar_lea.vmem [#allocation3], %s850_s5 }
  0x3e   : > { %s187_s30 = sshll.u32 %s175_s24, 4  ;;  %s184_s6 = sadd.s32 %s950_s23, %s851_s3  ;;  %s1504_s30 = int_to_ptr.vmem [resolvable:$true] %s187_s30 }
  0x3f   : > { %s852_s8 = sshll.u32 %s184_s6, 6  ;;  %s172_s19 = scalar_lea.sflag [#allocation4], %s1438_s27 }
  0x40   : > { %s1509_s7 = scalar_lea.hbm %s1759_s0, %s852_s8  ;;  %s1145_s5 = scalar_lea.hbm %s1759_s0, 3072 }
  0x41   : > { %s1140_s10 = scalar_lea.hbm %s1509_s7, 512  ;;  %p1146_p4 = scmp.lt.u32.totalorder %s1509_s7, %s1759_s0 }
  0x42   : > { %p1141_p2 = scmp.ne.s32.totalorder %s1509_s7, %s1140_s10  ;;  %p1147_p8 = scmp.lt.u32.totalorder %s1145_s5, %s1140_s10 }
  0x43   : > { %p1149_p12 = scmp.lt.u32.totalorder %s1140_s10, %s1509_s7 }
  0x44   : > { %p1143_p9 = pnand %p1141_p2, %p1112_p11  ;;  %p1148_p10 = por %p1147_p8, %p1146_p4 }
  0x46   : > { %p1144_p13 = pneg %p1143_p9  ;;  %p1150_p0 = por %p1149_p12, %p1148_p10 }
  0x48   : > { %p1151_p1 = pnand %p1150_p0, %p1144_p13 }
  0x4a   : > { %1154 = shalt.err (!%p1151_p1)
}
  0x4b   : > { %s1155_s1 = scalar_lea.vmem %s1504_s30, 512  ;;  %s1335_s24 = smov [#allocation3]  }
  0x4c   : > { %p1156_p3 = scmp.ne.s32.totalorder %s1504_s30, %s1155_s1  ;;  %s1160_s6 = sshll.u32 %s1335_s24, 4  ;;  %s1161_s6 = int_to_ptr.vmem [resolvable:$false] %s1160_s6 }
  0x4d   : > { %s1162_s8 = scalar_lea.vmem %s1161_s6, 1024  ;;  %p1163_p9 = scmp.lt.s32.totalorder %s1504_s30, %s1161_s6 }
  0x4e   : > { %p1158_p6 = pnand %p1156_p3, %p1112_p11  ;;  %p1164_p4 = scmp.lt.s32.totalorder %s1162_s8, %s1155_s1 }
  0x50   : > { %p1159_p2 = pneg %p1158_p6  ;;  %p1165_p8 = por %p1164_p4, %p1163_p9 }
  0x52   : > { %p1166_p10 = pnand %p1165_p8, %p1159_p2 }
  0x54   : > { %1169 = shalt.err (!%p1166_p10)
}
  0x55   : > { %s1336_s9 = smov 768   ;;  %s1337_s10 = smov 256  }
  0x56   : > { %s1338_s11 = smov 16   ;;  %s1538_s25 = sadd.s32 4294967295, %s1330_s22  }
  0x57   : > { %963 = dma.hbm_to_vmem [thread:$0]  (!%p1442_p7), %s1509_s7, 512, %s1504_s30, %s172_s19, %s1336_s9, %s1337_s10, %s1338_s11  }
  0x58   : > { %s847_s5 = sadd.s32 4294967294, %s1330_s22   ;;  %p66_p11 = scmp.eq.s32.totalorder %s1538_s25, 0 }
  0x59   : > { %p104_p13 = scmp.eq.s32.totalorder %s1448_s29, 0  ;;  %s106_s3 = sadd.s32 1, %s1298_s14 }
  0x5a   : > { %p1780_p12 = scmp.ne.s32.totalorder %s1306_s16, %s1302_s15  ;;  %p113_p1 = scmp.ne.s32.totalorder %s1298_s14, %s1294_s13 }
  0x5b   : > { %s1554_s1 = scalar_select %p104_p13, %s1298_s14, %s106_s3  }
  0x5c   : > { %p1547_p0 = por %p66_p11, %p1780_p12  ;;  %p1782_p3 = scmp.eq.s32.totalorder %s1330_s22, 0 }
  0x5d   : > { %p119_p6 = scmp.ne.s32.totalorder %s1294_s13, %s1290_s12  ;;  %p145_p2 = scmp.eq.s32.totalorder %s1538_s25, 5 }
  0x5e   : > { %s1781_s23 = scalar_select %p1547_p0, 1, 0 }
  0x5f   : > { %p1558_p7 = por %p113_p1, %p1782_p3  ;;  %p151_p9 = scmp.eq.s32.totalorder %s847_s5, 5 }
  0x60   : > { %p1565_p4 = por %p119_p6, %p66_p11  ;;  %s222_s15 = sand.u32 1, %s1298_s14  }
  0x61   : > { %p1570_p8 = por %p145_p2, %p113_p1  ;;  %p1574_p10 = por %p151_p9, %p119_p6 }
  0x62   : > { %s1784_s28 = scalar_select %p1565_p4, 1, 0 }
  0x63   : > { %s1785_s29 = scalar_select %p1570_p8, 1, 0 }
  0x64   : > { %s1786_s7 = scalar_select %p1574_p10, 1, 0 }
  0x65   : > { %s856_s30 = sshll.u32 %s1326_s21, 4  ;;  %s223_s8 = scalar_lea.vmem [#allocation8], %s222_s15 }
  0x66   : > { %s1582_s6 = scalar_lea.hbm %s1761_s2, %s856_s30  ;;  %s230_s9 = sshll.u32 %s223_s8, 4  ;;  %s1584_s9 = int_to_ptr.vmem [resolvable:$true] %s230_s9 }
  0x67   : > { %p1787_p11 = scmp.lt.s32.totalorder %s1330_s22, 6  ;;  %s1170_s11 = scalar_lea.hbm %s1582_s6, 16 }
  0x68   : > { %p1171_p12 = scmp.ne.s32.totalorder %s1582_s6, %s1170_s11  ;;  %s1175_s15 = scalar_lea.hbm %s1761_s2, 32 }
  0x69   : > { %p1590_p13 = pnand %p1787_p11, %p1558_p7  ;;  %p1176_p7 = scmp.lt.u32.totalorder %s1582_s6, %s1761_s2 }
  0x6a   : > { %p1177_p2 = scmp.lt.u32.totalorder %s1175_s15, %s1170_s11  ;;  %p1179_p11 = scmp.lt.u32.totalorder %s1170_s11, %s1582_s6 }
  0x6b   : > { %p1172_p1 = pneg %p1590_p13 }
  0x6c   : > { %p1178_p9 = por %p1177_p2, %p1176_p7 }
  0x6d   : > { %p1173_p3 = pnand %p1172_p1, %p1171_p12 }
  0x6e   : > { %p1180_p10 = por %p1179_p11, %p1178_p9 }
  0x6f   : > { %p1174_p6 = pneg %p1173_p3 }
  0x71   : > { %p1181_p8 = pnand %p1180_p10, %p1174_p6 }
  0x73   : > { %1184 = shalt.err (!%p1181_p8)
}
  0x74   : > { %s1185_s19 = scalar_lea.vmem %s1584_s9, 16  ;;  %s1339_s24 = smov [#allocation8]  }
  0x75   : > { %p1186_p12 = scmp.ne.s32.totalorder %s1584_s9, %s1185_s19  ;;  %s1190_s8 = sshll.u32 %s1339_s24, 4  ;;  %s1191_s8 = int_to_ptr.vmem [resolvable:$false] %s1190_s8 }
  0x76   : > { %s1192_s5 = scalar_lea.vmem %s1191_s8, 32  ;;  %p1193_p0 = scmp.lt.s32.totalorder %s1584_s9, %s1191_s8 }
  0x77   : > { %p1188_p3 = pnand %p1186_p12, %p1172_p1  ;;  %p1194_p7 = scmp.lt.s32.totalorder %s1192_s5, %s1185_s19 }
  0x79   : > { %p1189_p4 = pneg %p1188_p3  ;;  %p1195_p2 = por %p1194_p7, %p1193_p0 }
  0x7b   : > { %p1196_p9 = pnand %p1195_p2, %p1189_p4 }
  0x7d   : > { %1199 = shalt.err (!%p1196_p9)
}
  0x7e   : > { %969 = dma.hbm_to_vmem [thread:$0]  (!%p1590_p13), %s1582_s6, 16, %s1584_s9, %s1466_s26  }
  0x7f   : > { %239 = sbr.rel (%p1497_p5) target bundleno = 445 (0x1bd), region = 32  ;;  %s241_s11 = sand.u32 (!%p1497_p5), 1, %s1306_s16  }
  0x80   : > { %s858_s3 = sshll.u32 (!%p1497_p5), %s241_s11, 5  ;;  %s242_s15 = scalar_lea.sflag (!%p1497_p5), [#allocation4], %s241_s11 }
  0x81   : > { %s1623_s27 = scalar_lea.vmem (!%p1497_p5), [#allocation3], %s858_s3  ;;  %p1789_p8 = scmp.ne.s32.totalorder (!%p1497_p5), %s1781_s23, 0 }
  0x86   : > { %1273 = dma.done.wait (%p1789_p8), %s242_s15, 512  }
  0x87   : > { %1275 = vsyncadd (%p1789_p8), %s242_s15, 4294966784  ;;  %s250_s10 = sand.u32 1, %s1538_s25   ;;  %s859_s30 = sshll.u32 %s241_s11, 8 }
  0x88   : > { %s251_s26 = scalar_lea.sflag [#allocation7], %s250_s10  ;;  %s1630_s6 = scalar_lea.vmem [#allocation6], %s859_s30 }
  0x89   : > { %1277 = dma.done.wait (%p1789_p8), %s251_s26, 4096  }
  0x8a   : > { %1279 = vsyncadd (%p1789_p8), %s251_s26, 4294963200  ;;  %s1637_s4 = sand.u32 1, %s1294_s13   ;;  %p1790_p5 = scmp.ne.s32.totalorder %s1784_s28, 0 }
  0x8b   : > { %s262_s9 = scalar_lea.vmem [#allocation8], %s1637_s4 }
  0x8c   : > { %1281 = dma.done.wait (%p1790_p5), %s251_s26, 16  }
  0x8d   : > { %1283 = vsyncadd (%p1790_p5), %s251_s26, 4294967280  ;;  %s860_s25 = sshll.u32 %s1637_s4, 4  ;;  %p861_p0 = scmp.ne.s32.totalorder %s1314_s18, 0 }
  0x8e   : > { %s1645_s19 = scalar_lea.vmem [#allocation9], %s860_s25  ;;  %vm303_vm0 = vcmask (!%p861_p0), 261120   ;;  %v1340_v0 = vmov (!%p861_p0), 0.0  }
  0x8f   : > { %302 = sbr.rel (%p861_p0) target bundleno = 150 (0x96), region = 48  ;;  %304 = vst.msk [vmem:[#allocation2] sm:$0xff] (!%p861_p0), %vm303_vm0, %v1340_v0  ;;  %305 = vst.msk [vmem:[#allocation2 + $0x8] sm:$0xff] (!%p861_p0), %vm303_vm0, %v1340_v0 }
  0x96 PF: > { %v1072_v1 = vld [vmem:[%s1630_s6 + $0x40] sm:$0xff]   ;;  %v1076_v5 = vld [vmem:[%s1630_s6 + $0x48] sm:$0xff]   ;;  %v1080_v9 = vld [vmem:[%s1630_s6 + $0x50] sm:$0xff]   ;;  %vm672_vm1 = vcmask 261120   ;;  %p898_p4 = scmp.ne.s32.totalorder %s1314_s18, 2 }
  0x97   : > { %v1073_v2 = vld [vmem:[%s1630_s6 + $0xc0] sm:$0xff]   ;;  %906 = vmatprep.subr.bf16.mxu0 %v1072_v1  ;;  %v1077_v6 = vld [vmem:[%s1630_s6 + $0xc8] sm:$0xff]   ;;  %v1081_v10 = vld [vmem:[%s1630_s6 + $0xd0] sm:$0xff]  }
  0x98   : > { %v1074_v3 = vld [vmem:[%s1630_s6] sm:$0xff]   ;;  %928 = vmatprep.subr.bf16.mxu1 %v1073_v2  ;;  %v1078_v7 = vld [vmem:[%s1630_s6 + $0x8] sm:$0xff]   ;;  %v1082_v11 = vld [vmem:[%s1630_s6 + $0x10] sm:$0xff]  }
  0x99   : > { %v1075_v4 = vld [vmem:[%s1630_s6 + $0x80] sm:$0xff]   ;;  %907 = vmatpush3.bf16.msra.mxu0 %v1074_v3  ;;  %v1079_v8 = vld [vmem:[%s1630_s6 + $0x88] sm:$0xff]   ;;  %v1083_v12 = vld [vmem:[%s1630_s6 + $0x90] sm:$0xff]  }
  0x9a   : > { %929 = vmatpush3.bf16.msra.mxu1 %v1075_v4  ;;  %908 = vmatprep.subr.bf16.mxu0 %v1076_v5  ;;  %v1084_v13 = vld [vmem:[%s1630_s6 + $0x58] sm:$0xff]   ;;  %v1088_v17 = vld [vmem:[%s1630_s6 + $0x60] sm:$0xff]   ;;  %v1092_v21 = vld [vmem:[%s1630_s6 + $0x68] sm:$0xff]  }
  0x9b   : > { %930 = vmatprep.subr.bf16.mxu1 %v1077_v6  ;;  %v1085_v14 = vld [vmem:[%s1630_s6 + $0xd8] sm:$0xff]   ;;  %v1089_v18 = vld [vmem:[%s1630_s6 + $0xe0] sm:$0xff]   ;;  %v1093_v22 = vld [vmem:[%s1630_s6 + $0xe8] sm:$0xff]  }
  0x9c   : > { %v1086_v15 = vld [vmem:[%s1630_s6 + $0x18] sm:$0xff]   ;;  %v1090_v19 = vld [vmem:[%s1630_s6 + $0x20] sm:$0xff]   ;;  %v1094_v23 = vld [vmem:[%s1630_s6 + $0x28] sm:$0xff]  }
  0x9d   : > { %909 = vmatpush3.bf16.msra.mxu0 %v1078_v7  ;;  %v1087_v16 = vld [vmem:[%s1630_s6 + $0x98] sm:$0xff]   ;;  %v1091_v20 = vld [vmem:[%s1630_s6 + $0xa0] sm:$0xff]   ;;  %v1095_v24 = vld [vmem:[%s1630_s6 + $0xa8] sm:$0xff]  }
  0x9e   : > { %931 = vmatpush3.bf16.msra.mxu1 %v1079_v8  ;;  %910 = vmatprep.subr.bf16.mxu0 %v1080_v9  ;;  %v1096_v25 = vld [vmem:[%s1630_s6 + $0x70] sm:$0xff]   ;;  %v1100_v29 = vld [vmem:[%s1630_s6 + $0x78] sm:$0xff]  }
  0x9f   : > { %932 = vmatprep.subr.bf16.mxu1 %v1081_v10  ;;  %v1097_v26 = vld [vmem:[%s1630_s6 + $0xf0] sm:$0xff]   ;;  %v1101_v30 = vld [vmem:[%s1630_s6 + $0xf8] sm:$0xff]  }
  0xa0   : > { %v1098_v27 = vld [vmem:[%s1630_s6 + $0x30] sm:$0xff]   ;;  %v1102_v31 = vld [vmem:[%s1630_s6 + $0x38] sm:$0xff]  }
  0xa1   : > { %911 = vmatpush3.bf16.msra.mxu0 %v1082_v11  ;;  %v1099_v28 = vld [vmem:[%s1630_s6 + $0xb0] sm:$0xff]   ;;  %v1103_v32 = vld [vmem:[%s1630_s6 + $0xb8] sm:$0xff]  }
  0xa2   : > { %933 = vmatpush3.bf16.msra.mxu1 %v1083_v12  ;;  %912 = vmatprep.subr.bf16.mxu0 %v1084_v13  ;;  %v1104_v33 = vld [vmem:[%s1623_s27] ss:$16 sps:$4 sm:$0xff]   ;;  %v1106_v34 = vld [vmem:[%s1623_s27 + $0x4] ss:$16 sps:$4 sm:$0xff]   ;;  %v1107_v35 = vld [vmem:[%s1623_s27 + $0x8] ss:$16 sps:$4 sm:$0xff]  }
  0xa3   : > { %934 = vmatprep.subr.bf16.mxu1 %v1085_v14  ;;  %v1109_v36 = vld [vmem:[%s1623_s27 + $0xc] ss:$16 sps:$4 sm:$0xff]   ;;  %620 = vmatprep.mubr.bf16.mxu0 %v1106_v34  ;;  %v306_v46 = vld [vmem:[#allocation2] sm:$0xff] }
  0xa4   : > { %661 = vmatprep.mubr.bf16.mxu1 %v1109_v36  ;;  %v307_v51 = vld [vmem:[#allocation2 + $0x8] sm:$0xff]  ;;  %v899_v56 = vld [vmem:[%s262_s9] ss:$0 sm:$0xff] (!%p898_p4) }
  0xa5   : > { %913 = vmatpush3.bf16.msra.mxu0 %v1086_v15 }
  0xa6   : > { %935 = vmatpush3.bf16.msra.mxu1 %v1087_v16  ;;  %914 = vmatprep.subr.bf16.mxu0 %v1088_v17 }
  0xa7   : > { %936 = vmatprep.subr.bf16.mxu1 %v1089_v18 }
  0xa9   : > { %915 = vmatpush3.bf16.msra.mxu0 %v1090_v19 }
  0xaa   : > { %937 = vmatpush3.bf16.msra.mxu1 %v1091_v20  ;;  %916 = vmatprep.subr.bf16.mxu0 %v1092_v21 }
  0xab   : > { %938 = vmatprep.subr.bf16.mxu1 %v1093_v22 }
  0xad   : > { %917 = vmatpush3.bf16.msra.mxu0 %v1094_v23 }
  0xae   : > { %939 = vmatpush3.bf16.msra.mxu1 %v1095_v24  ;;  %918 = vmatprep.subr.bf16.mxu0 %v1096_v25 }
  0xaf   : > { %940 = vmatprep.subr.bf16.mxu1 %v1097_v26 }
  0xb1   : > { %919 = vmatpush3.bf16.msra.mxu0 %v1098_v27 }
  0xb2   : > { %941 = vmatpush3.bf16.msra.mxu1 %v1099_v28  ;;  %920 = vmatprep.subr.bf16.mxu0 %v1100_v29 }
  0xb3   : > { %942 = vmatprep.subr.bf16.mxu1 %v1101_v30 }
  0xb5   : > { %921 = vmatpush3.bf16.msra.mxu0 %v1102_v31 }
  0xb6   : > { %943 = vmatpush3.bf16.msra.mxu1 %v1103_v32 }
  0xb8   : > { %621 = vmatmul.mubr.bf16.vlgmr.msra.gmra.mrb[0].mxu0 %v1104_v33 }
  0xb9   : > { %662 = vmatmul.mubr.bf16.vlgmr.msra.gmra.mrb[0].mxu1 %v1107_v35 }
 0x18b   : > { %v922_v37 = vpop.f32.mrb[0].mxu0 }
 0x18c   : > { %v944_v38 = vpop.f32.mrb[0].mxu1  ;;  %v923_v39 = vpop.f32.mrb[1].mxu0 }
 0x18d   : > { %v924_v40 = vadd.f32 %v923_v39, %v922_v37  ;;  %v945_v41 = vpop.f32.mrb[1].mxu1  ;;  %v925_v42 = vpop.f32.mrb[2].mxu0 }
 0x18e   : > { %v946_v43 = vadd.f32 %v945_v41, %v944_v38  ;;  %v947_v44 = vpop.f32.mrb[2].mxu1  ;;  %v926_v45 = vpop.f32.mrb[3].mxu0 }
 0x18f   : > { %v927_v47 = vadd.f32 %v926_v45, %v925_v42  ;;  %v948_v48 = vpop.f32.mrb[3].mxu1 }
 0x190   : > { %v664_v49 = vadd.f32 %v946_v43, %v924_v40  ;;  %v949_v50 = vadd.f32 %v948_v48, %v947_v44  ;;  %678 = sbr.rel (%p898_p4) target bundleno = 417 (0x1a1), region = 52 }
 0x192   : > { %v670_v52 = vadd.f32 %v664_v49, %v306_v46  ;;  %v667_v53 = vadd.f32 %v949_v50, %v927_v47 }
 0x194   : > { %673 = vst.msk [vmem:[#allocation2] sm:$0xff] %vm672_vm1, %v670_v52  ;;  %v671_v54 = vadd.f32 %v667_v53, %v307_v51 }
 0x196   : > { %674 = vst.msk [vmem:[#allocation2 + $0x8] sm:$0xff] %vm672_vm1, %v671_v54 }
 0x19b   : > { %v679_v55 = vld [vmem:[#allocation2] sm:$0xff] }
 0x19c   : > { %v688_v58 = vadd.f32 %v899_v56, %v679_v55 }
 0x19d   : > { %v680_v57 = vld [vmem:[#allocation2 + $0x8] sm:$0xff] }
 0x19e   : > { %v689_v59 = vadd.f32 %v899_v56, %v680_v57  ;;  %690 = vst.msk [vmem:[%s1645_s19] sm:$0xff] %vm672_vm1, %v688_v58 }
 0x1a0   : > { %691 = vst.msk [vmem:[%s1645_s19 + $0x8] sm:$0xff] %vm672_vm1, %v689_v59 }
 0x1a1 PF: > { %s1791_s23 = sld [smem:[#allocation14_spill]]  ;;  %s1792_s8 = sld [smem:[#allocation19_spill]] }
 0x1a2   : > { %s708_s11 = sshll.u32 %s1645_s19, 4  ;;  %s693_s3 = scalar_lea.sflag [#allocation5], %s1637_s4  ;;  %s1696_s11 = int_to_ptr.vmem [resolvable:$true] %s708_s11 }
 0x1a3   : > { %s1200_s15 = scalar_lea.vmem %s1696_s11, 256  ;;  %p1793_p13 = scmp.ne.s32.totalorder %s1785_s29, 0 }
 0x1a4   : > { %p1201_p10 = scmp.ne.s32.totalorder %s1696_s11, %s1200_s15  ;;  %s1341_s27 = smov [#allocation9]  }
 0x1a5   : > { %s1204_s10 = sshll.u32 %s1341_s27, 4  ;;  %s1205_s10 = int_to_ptr.vmem [resolvable:$false] %s1204_s10 }
 0x1a6   : > { %p1202_p1 = pnand %p1201_p10, %p1793_p13  ;;  %s1206_s30 = scalar_lea.vmem %s1205_s10, 512 }
 0x1a7   : > { %s905_s28 = sshll.u32 %s1791_s23, 8  ;;  %p1207_p11 = scmp.lt.s32.totalorder %s1696_s11, %s1205_s10 }
 0x1a8   : > { %s1693_s5 = scalar_lea.hbm %s1792_s8, %s905_s28  ;;  %p1203_p6 = pneg %p1202_p1 }
 0x1a9   : > { %p1208_p12 = scmp.lt.s32.totalorder %s1206_s30, %s1200_s15 }
 0x1ab   : > { %p1209_p3 = por %p1208_p12, %p1207_p11 }
 0x1ad   : > { %p1210_p7 = pnand %p1209_p3, %p1203_p6 }
 0x1af   : > { %1213 = shalt.err (!%p1210_p7)
}
 0x1b0   : > { %s1214_s26 = scalar_lea.hbm %s1693_s5, 256  ;;  %s1218_s25 = scalar_lea.hbm %s1792_s8, 512 }
 0x1b1   : > { %p1215_p2 = scmp.ne.s32.totalorder %s1693_s5, %s1214_s26  ;;  %p1219_p5 = scmp.lt.u32.totalorder %s1693_s5, %s1792_s8 }
 0x1b2   : > { %p1220_p0 = scmp.lt.u32.totalorder %s1218_s25, %s1214_s26  ;;  %p1222_p10 = scmp.lt.u32.totalorder %s1214_s26, %s1693_s5 }
 0x1b3   : > { %p1216_p9 = pnand %p1215_p2, %p1793_p13 }
 0x1b4   : > { %p1221_p4 = por %p1220_p0, %p1219_p5 }
 0x1b5   : > { %p1217_p8 = pneg %p1216_p9 }
 0x1b6   : > { %p1223_p1 = por %p1222_p10, %p1221_p4 }
 0x1b8   : > { %p1224_p6 = pnand %p1223_p1, %p1217_p8 }
 0x1ba   : > { %1227 = shalt.err (!%p1224_p6)
}
 0x1bb   : > { %s1342_s28 = smov 128   ;;  %s1343_s24 = smov 8  }
 0x1bc   : > { %958 = dma.vmem_to_hbm [thread:$0]  (%p1793_p13), %s1696_s11, 256, %s1693_s5, %s693_s3, %s1342_s28, %s1342_s28, %s1343_s24  }
 0x1bd PF: > { %p975_p11 = scmp.ge.s32.totalorder %s1330_s22, 2  ;;  %s723_s18 = sand.u32 1, %s1290_s12  }
 0x1be   : > { %p1794_p12 = scmp.ne.s32.totalorder %s1786_s7, 0  ;;  %s724_s15 = scalar_lea.sflag [#allocation5], %s723_s18 }
 0x1c0   : > { %p971_p3 = pnand %p975_p11, %p1794_p12 }
 0x1c2   : > { %1285 = dma.done.wait (!%p971_p3), %s724_s15, 256  }
 0x1c3   : > { %1287 = vsyncadd (!%p971_p3), %s724_s15, 4294967040  ;;  %s22_s22 = sadd.s32 1, %s1330_s22   ;;  %s1795_s29 = sld [smem:[#allocation17_spill]] }
 0x1c4   : > { %p19_p7 = scmp.ge.s32.totalorder %s22_s22, 8   ;;  %s1796_s4 = sld [smem:[#allocation15_spill]] }
 0x1c5   : > { %s1797_s5 = sld [smem:[#allocation16_spill]]  ;;  %s1798_s12 = smov %s1294_s13 }
 0x1c6   : > { %s1799_s13 = smov %s1298_s14  ;;  %s1800_s14 = smov %s1554_s1 }
 0x1c7   : > { %s1801_s15 = smov %s1306_s16  ;;  %s1802_s16 = smov %s1310_s17 }
 0x1c8   : > { %s1804_s18 = smov %s1322_s20  ;;  %s1805_s19 = smov %s1326_s21 }
 0x1c9   : > { %s1803_s17 = smov %s1795_s29  ;;  %21 = sbr.rel (!%p19_p7) target bundleno = 14 (0xe), region = 109 }
 0x1ca   : > { %s1806_s20 = smov %s1796_s4 }
 0x1cb   : > { %s1807_s21 = smov %s1797_s5 }
 0x1d0   :  { %729 = vsyncpa [#allocation4], 1 }
 0x1d1   :  { %731 = vsyncpa [#allocation4 + $0x1], 1 }
 0x1d2   :  { %732 = vsyncpa [#allocation7], 1 }
 0x1d3   :  { %734 = vsyncpa [#allocation7 + $0x1], 1 }
 0x1d4   :  { %735 = vsyncpa [#allocation5], 1 }
 0x1d5   :  { %737 = vsyncpa [#allocation5 + $0x1], 1 }

// kernel: model_forward.3
= control target key start
LH: loop header
LB: loop body
LE: loop exit
PB: predicated region body
PF: predicated region fallthrough
CT: control target
= control target key end

     0   :  { %16 = vsyncpa [#allocation3], 0  ;;  %s1811_s0 = inlined_call_operand.hbm [shape: f32[16,32], index: 0, kind: input, shape index: {}]   ;;  %s1812_s1 = inlined_call_operand.hbm [shape: f32[16,32], index: 1, kind: input, shape index: {}]   ;;  %s1813_s2 = inlined_call_operand.hbm [shape: f32[16,32], index: 2, kind: input, shape index: {}]   ;;  %s1814_s3 = inlined_call_operand.hbm [shape: bf16[16,16], index: 3, kind: input, shape index: {}]   ;;  %s1815_s4 = inlined_call_operand.hbm [shape: bf16[16,16], index: 4, kind: input, shape index: {}]   ;;  %s1816_s5 = inlined_call_operand.hbm [shape: bf16[16,16], index: 5, kind: input, shape index: {}]   ;;  %s1817_s6 = inlined_call_operand.hbm [shape: bf16[16,16], index: 6, kind: input, shape index: {}]   ;;  %s1818_s7 = inlined_call_operand.hbm [shape: f32[2,96,32], index: 7, kind: input, shape index: {}]   ;;  %s1819_s8 = inlined_call_operand.hbm [shape: f32[2,1,32], index: 8, kind: input, shape index: {}]   ;;  %s1820_s9 = inlined_call_operand.hbm [shape: f32[96,32], index: 9, kind: input, shape index: {}]   ;;  %s1821_s10 = inlined_call_operand.hbm [shape: f32[1,32], index: 10, kind: input, shape index: {}]   ;;  %s1822_s11 = inlined_call_operand.hbm [shape: f32[16,32], index: 11, kind: output, shape index: {}]  }
   0x1   :  { %17 = vsyncpa [#allocation6], 0 }
   0x2   :  { %18 = vsyncpa [#allocation9], 0 }
   0x3   :  { %19 = vsyncpa [#allocation12], 0 }
   0x4   :  { %20 = vsyncpa [#allocation15], 0 }
   0x5   :  { %21 = vsyncpa [#allocation18], 0 }
   0x6   :  { %22 = vsyncpa [#allocation4], 0  ;;  %s1443_s17 = smov [#allocation5]   ;;  %s1444_s19 = smov [#allocation8]  }
   0x7   :  { %s40_s18 = sshll.u32 %s1443_s17, 4  ;;  %s64_s20 = sshll.u32 %s1444_s19, 4  ;;  %s41_s18 = int_to_ptr.vmem [resolvable:$true] %s40_s18  ;;  %s1524_s20 = int_to_ptr.vmem [resolvable:$true] %s64_s20 }
   0x8   :  { %s1165_s23 = scalar_lea.hbm %s1812_s1, 256 }
   0x9   :  { %p1166_p0 = scmp.ne.s32.totalorder %s1812_s1, %s1165_s23  ;;  %p1169_p1 = scmp.lt.u32.totalorder %s1165_s23, %s1812_s1 }
   0xb   :  { %p1171_p2 = pnand %p1169_p1, %p1166_p0 }
   0xd   :  { %1174 = shalt.err (!%p1171_p2)
}
   0xe   :  { %s1175_s28 = scalar_lea.vmem %s41_s18, 256  ;;  %p1180_p4 = scmp.lt.s32.totalorder %s41_s18, %s41_s18 }
   0xf   :  { %p1176_p3 = scmp.ne.s32.totalorder %s41_s18, %s1175_s28  ;;  %p1181_p5 = scmp.lt.s32.totalorder %s1175_s28, %s1175_s28 }
  0x11   :  { %p1182_p6 = por %p1181_p5, %p1180_p4 }
  0x13   :  { %p1183_p7 = pnand %p1182_p6, %p1176_p3 }
  0x15   :  { %1186 = shalt.err (!%p1183_p7)
}
  0x16   :  { %s1445_s29 = smov 128   ;;  %s1446_s30 = smov 8  }
  0x17   :  { %46 = dma.hbm_to_vmem [thread:$0]  %s1812_s1, 256, %s41_s18, [#allocation6], %s1445_s29, %s1445_s29, %s1446_s30  }
  0x18   :  { %s1187_s16 = scalar_lea.hbm %s1814_s3, 128 }
  0x19   :  { %p1188_p8 = scmp.ne.s32.totalorder %s1814_s3, %s1187_s16  ;;  %p1191_p9 = scmp.lt.u32.totalorder %s1187_s16, %s1814_s3 }
  0x1b   :  { %p1193_p10 = pnand %p1191_p9, %p1188_p8 }
  0x1d   :  { %1196 = shalt.err (!%p1193_p10)
}
  0x1e   :  { %s1197_s23 = scalar_lea.vmem %s1524_s20, 128  ;;  %p1202_p12 = scmp.lt.s32.totalorder %s1524_s20, %s1524_s20 }
  0x1f   :  { %p1198_p11 = scmp.ne.s32.totalorder %s1524_s20, %s1197_s23  ;;  %p1203_p13 = scmp.lt.s32.totalorder %s1197_s23, %s1197_s23 }
  0x21   :  { %p1204_p0 = por %p1203_p13, %p1202_p12 }
  0x23   :  { %p1205_p1 = pnand %p1204_p0, %p1198_p11 }
  0x25   :  { %1208 = shalt.err (!%p1205_p1)
}
  0x26   :  { %s1447_s1 = smov 64   ;;  %s1448_s18 = smov 4  }
  0x27   :  { %70 = dma.hbm_to_vmem [thread:$0]  %s1814_s3, 128, %s1524_s20, [#allocation9], %s1447_s1, %s1447_s1, %s1448_s18  }
  0x28   :  { %s1449_s26 = smov [#allocation11]   ;;  %s1450_s28 = smov [#allocation14]  }
  0x29   :  { %s88_s27 = sshll.u32 %s1449_s26, 4  ;;  %s112_s12 = sshll.u32 %s1450_s28, 4  ;;  %s89_s27 = int_to_ptr.vmem [resolvable:$true] %s88_s27  ;;  %s1561_s12 = int_to_ptr.vmem [resolvable:$true] %s112_s12 }
  0x2a   :  { %s1209_s15 = scalar_lea.hbm %s1816_s5, 128 }
  0x2b   :  { %p1210_p2 = scmp.ne.s32.totalorder %s1816_s5, %s1209_s15  ;;  %p1213_p3 = scmp.lt.u32.totalorder %s1209_s15, %s1816_s5 }
  0x2d   :  { %p1215_p4 = pnand %p1213_p3, %p1210_p2 }
  0x2f   :  { %1218 = shalt.err (!%p1215_p4)
}
  0x30   :  { %s1219_s3 = scalar_lea.vmem %s89_s27, 128  ;;  %p1224_p6 = scmp.lt.s32.totalorder %s89_s27, %s89_s27 }
  0x31   :  { %p1220_p5 = scmp.ne.s32.totalorder %s89_s27, %s1219_s3  ;;  %p1225_p7 = scmp.lt.s32.totalorder %s1219_s3, %s1219_s3 }
  0x33   :  { %p1226_p8 = por %p1225_p7, %p1224_p6 }
  0x35   :  { %p1227_p9 = pnand %p1226_p8, %p1220_p5 }
  0x37   :  { %1230 = shalt.err (!%p1227_p9)
}
  0x38   :  { %94 = dma.hbm_to_vmem [thread:$0]  %s1816_s5, 128, %s89_s27, [#allocation12], %s1447_s1, %s1447_s1, %s1448_s18  }
  0x39   :  { %s1231_s25 = scalar_lea.hbm %s1818_s7, 3072 }
  0x3a   :  { %p1232_p10 = scmp.ne.s32.totalorder %s1818_s7, %s1231_s25  ;;  %p1235_p11 = scmp.lt.u32.totalorder %s1231_s25, %s1818_s7 }
  0x3c   :  { %p1237_p12 = pnand %p1235_p11, %p1232_p10 }
  0x3e   :  { %1240 = shalt.err (!%p1237_p12)
}
  0x3f   :  { %s1241_s15 = scalar_lea.vmem %s1561_s12, 3072  ;;  %p1246_p0 = scmp.lt.s32.totalorder %s1561_s12, %s1561_s12 }
  0x40   :  { %p1242_p13 = scmp.ne.s32.totalorder %s1561_s12, %s1241_s15  ;;  %p1247_p1 = scmp.lt.s32.totalorder %s1241_s15, %s1241_s15 }
  0x42   :  { %p1248_p2 = por %p1247_p1, %p1246_p0 }
  0x44   :  { %p1249_p3 = pnand %p1248_p2, %p1242_p13 }
  0x46   :  { %1252 = shalt.err (!%p1249_p3)
}
  0x47   :  { %118 = dma.hbm_to_vmem [thread:$0]  %s1818_s7, 3072, %s1561_s12, [#allocation15], %s1445_s29, %s1445_s29, %s1446_s30  }
  0x48   :  { %s1451_s16 = smov [#allocation17]   ;;  %s1452_s19 = smov [#allocation2]  }
  0x49   :  { %s136_s17 = sshll.u32 %s1451_s16, 4  ;;  %s28_s21 = sshll.u32 %s1452_s19, 4  ;;  %s137_s17 = int_to_ptr.vmem [resolvable:$true] %s136_s17  ;;  %s1598_s21 = int_to_ptr.vmem [resolvable:$true] %s28_s21 }
  0x4a   :  { %s1253_s22 = scalar_lea.hbm %s1820_s9, 1536 }
  0x4b   :  { %p1254_p4 = scmp.ne.s32.totalorder %s1820_s9, %s1253_s22  ;;  %p1257_p5 = scmp.lt.u32.totalorder %s1253_s22, %s1820_s9 }
  0x4d   :  { %p1259_p6 = pnand %p1257_p5, %p1254_p4 }
  0x4f   :  { %1262 = shalt.err (!%p1259_p6)
}
  0x50   :  { %s1263_s7 = scalar_lea.vmem %s137_s17, 1536  ;;  %p1268_p8 = scmp.lt.s32.totalorder %s137_s17, %s137_s17 }
  0x51   :  { %p1264_p7 = scmp.ne.s32.totalorder %s137_s17, %s1263_s7  ;;  %p1269_p9 = scmp.lt.s32.totalorder %s1263_s7, %s1263_s7 }
  0x53   :  { %p1270_p10 = por %p1269_p9, %p1268_p8 }
  0x55   :  { %p1271_p11 = pnand %p1270_p10, %p1264_p7 }
  0x57   :  { %1274 = shalt.err (!%p1271_p11)
}
  0x58   :  { %142 = dma.hbm_to_vmem [thread:$0]  %s1820_s9, 1536, %s137_s17, [#allocation18], %s1445_s29, %s1445_s29, %s1446_s30  }
  0x59   :  { %s1275_s15 = scalar_lea.hbm %s1811_s0, 256 }
  0x5a   :  { %p1276_p12 = scmp.ne.s32.totalorder %s1811_s0, %s1275_s15  ;;  %p1279_p13 = scmp.lt.u32.totalorder %s1275_s15, %s1811_s0 }
  0x5c   :  { %p1281_p0 = pnand %p1279_p13, %p1276_p12 }
  0x5e   :  { %1284 = shalt.err (!%p1281_p0)
}
  0x5f   :  { %s1285_s3 = scalar_lea.vmem %s1598_s21, 256  ;;  %p1290_p2 = scmp.lt.s32.totalorder %s1598_s21, %s1598_s21 }
  0x60   :  { %p1286_p1 = scmp.ne.s32.totalorder %s1598_s21, %s1285_s3  ;;  %p1291_p3 = scmp.lt.s32.totalorder %s1285_s3, %s1285_s3 }
  0x62   :  { %p1292_p4 = por %p1291_p3, %p1290_p2 }
  0x64   :  { %p1293_p5 = pnand %p1292_p4, %p1286_p1 }
  0x66   :  { %1296 = shalt.err (!%p1293_p5)
}
  0x67   :  { %34 = dma.hbm_to_vmem [thread:$0]  %s1811_s0, 256, %s1598_s21, [#allocation3], %s1445_s29, %s1445_s29, %s1446_s30  }
  0x68   :  { %s1453_s20 = smov [#allocation7]   ;;  %s1454_s23 = smov [#allocation10]  }
  0x69   :  { %s52_s22 = sshll.u32 %s1453_s20, 4  ;;  %s76_s24 = sshll.u32 %s1454_s23, 4  ;;  %s53_s22 = int_to_ptr.vmem [resolvable:$true] %s52_s22  ;;  %s1635_s24 = int_to_ptr.vmem [resolvable:$true] %s76_s24 }
  0x6a   :  { %s1297_s7 = scalar_lea.hbm %s1813_s2, 256 }
  0x6b   :  { %p1298_p6 = scmp.ne.s32.totalorder %s1813_s2, %s1297_s7  ;;  %p1301_p7 = scmp.lt.u32.totalorder %s1297_s7, %s1813_s2 }
  0x6d   :  { %p1303_p8 = pnand %p1301_p7, %p1298_p6 }
  0x6f   :  { %1306 = shalt.err (!%p1303_p8)
}
  0x70   :  { %s1307_s0 = scalar_lea.vmem %s53_s22, 256  ;;  %p1312_p10 = scmp.lt.s32.totalorder %s53_s22, %s53_s22 }
  0x71   :  { %p1308_p9 = scmp.ne.s32.totalorder %s53_s22, %s1307_s0  ;;  %p1313_p11 = scmp.lt.s32.totalorder %s1307_s0, %s1307_s0 }
  0x73   :  { %p1314_p12 = por %p1313_p11, %p1312_p10 }
  0x75   :  { %p1315_p13 = pnand %p1314_p12, %p1308_p9 }
  0x77   :  { %1318 = shalt.err (!%p1315_p13)
}
  0x78   :  { %58 = dma.hbm_to_vmem [thread:$0]  %s1813_s2, 256, %s53_s22, [#allocation6], %s1445_s29, %s1445_s29, %s1446_s30  }
  0x79   :  { %s1319_s16 = scalar_lea.hbm %s1815_s4, 128 }
  0x7a   :  { %p1320_p0 = scmp.ne.s32.totalorder %s1815_s4, %s1319_s16  ;;  %p1323_p1 = scmp.lt.u32.totalorder %s1319_s16, %s1815_s4 }
  0x7c   :  { %p1325_p2 = pnand %p1323_p1, %p1320_p0 }
  0x7e   :  { %1328 = shalt.err (!%p1325_p2)
}
  0x7f   :  { %s1329_s20 = scalar_lea.vmem %s1635_s24, 128  ;;  %p1334_p4 = scmp.lt.s32.totalorder %s1635_s24, %s1635_s24 }
  0x80   :  { %p1330_p3 = scmp.ne.s32.totalorder %s1635_s24, %s1329_s20  ;;  %p1335_p5 = scmp.lt.s32.totalorder %s1329_s20, %s1329_s20 }
  0x82   :  { %p1336_p6 = por %p1335_p5, %p1334_p4 }
  0x84   :  { %p1337_p7 = pnand %p1336_p6, %p1330_p3 }
  0x86   :  { %1340 = shalt.err (!%p1337_p7)
}
  0x87   :  { %82 = dma.hbm_to_vmem [thread:$0]  %s1815_s4, 128, %s1635_s24, [#allocation9], %s1447_s1, %s1447_s1, %s1448_s18  }
  0x88   :  { %s1455_s23 = smov [#allocation13]   ;;  %s1456_s26 = smov [#allocation16]  }
  0x89   :  { %s100_s25 = sshll.u32 %s1455_s23, 4  ;;  %s124_s7 = sshll.u32 %s1456_s26, 4  ;;  %s101_s25 = int_to_ptr.vmem [resolvable:$true] %s100_s25  ;;  %s1672_s7 = int_to_ptr.vmem [resolvable:$true] %s124_s7 }
  0x8a   :  { %s1341_s13 = scalar_lea.hbm %s1817_s6, 128 }
  0x8b   :  { %p1342_p8 = scmp.ne.s32.totalorder %s1817_s6, %s1341_s13  ;;  %p1345_p9 = scmp.lt.u32.totalorder %s1341_s13, %s1817_s6 }
  0x8d   :  { %p1347_p10 = pnand %p1345_p9, %p1342_p8 }
  0x8f   :  { %1350 = shalt.err (!%p1347_p10)
}
  0x90   :  { %s1351_s4 = scalar_lea.vmem %s101_s25, 128  ;;  %p1356_p12 = scmp.lt.s32.totalorder %s101_s25, %s101_s25 }
  0x91   :  { %p1352_p11 = scmp.ne.s32.totalorder %s101_s25, %s1351_s4  ;;  %p1357_p13 = scmp.lt.s32.totalorder %s1351_s4, %s1351_s4 }
  0x93   :  { %p1358_p0 = por %p1357_p13, %p1356_p12 }
  0x95   :  { %p1359_p1 = pnand %p1358_p0, %p1352_p11 }
  0x97   :  { %1362 = shalt.err (!%p1359_p1)
}
  0x98   :  { %106 = dma.hbm_to_vmem [thread:$0]  %s1817_s6, 128, %s101_s25, [#allocation12], %s1447_s1, %s1447_s1, %s1448_s18  }
  0x99   :  { %s1363_s19 = scalar_lea.hbm %s1819_s8, 32 }
  0x9a   :  { %p1364_p2 = scmp.ne.s32.totalorder %s1819_s8, %s1363_s19  ;;  %p1367_p3 = scmp.lt.u32.totalorder %s1363_s19, %s1819_s8 }
  0x9c   :  { %p1369_p4 = pnand %p1367_p3, %p1364_p2 }
  0x9e   :  { %1372 = shalt.err (!%p1369_p4)
}
  0x9f   :  { %s1373_s2 = scalar_lea.vmem %s1672_s7, 32  ;;  %p1378_p6 = scmp.lt.s32.totalorder %s1672_s7, %s1672_s7 }
  0xa0   :  { %p1374_p5 = scmp.ne.s32.totalorder %s1672_s7, %s1373_s2  ;;  %p1379_p7 = scmp.lt.s32.totalorder %s1373_s2, %s1373_s2 }
  0xa2   :  { %p1380_p8 = por %p1379_p7, %p1378_p6 }
  0xa4   :  { %p1381_p9 = pnand %p1380_p8, %p1374_p5 }
  0xa6   :  { %1384 = shalt.err (!%p1381_p9)
}
  0xa7   :  { %s1457_s6 = smov 16   ;;  %s1458_s18 = smov 1  }
  0xa8   :  { %130 = dma.hbm_to_vmem [thread:$0]  %s1819_s8, 32, %s1672_s7, [#allocation15], %s1457_s6, %s1457_s6, %s1458_s18  }
  0xa9   :  { %s1459_s25 = smov [#allocation19]   ;;  %s1385_s13 = scalar_lea.hbm %s1821_s10, 16 }
  0xaa   :  { %s149_s26 = sshll.u32 %s1459_s25, 4  ;;  %p1386_p10 = scmp.ne.s32.totalorder %s1821_s10, %s1385_s13  ;;  %s150_s26 = int_to_ptr.vmem [resolvable:$true] %s149_s26 }
  0xab   :  { %p1389_p11 = scmp.lt.u32.totalorder %s1385_s13, %s1821_s10 }
  0xad   :  { %p1391_p12 = pnand %p1389_p11, %p1386_p10 }
  0xaf   :  { %1394 = shalt.err (!%p1391_p12)
}
  0xb0   :  { %s1395_s4 = scalar_lea.vmem %s150_s26, 16  ;;  %s1399_s8 = scalar_lea.vmem %s150_s26, 32 }
  0xb1   :  { %p1396_p13 = scmp.ne.s32.totalorder %s150_s26, %s1395_s4  ;;  %p1400_p0 = scmp.lt.s32.totalorder %s150_s26, %s150_s26 }
  0xb2   :  { %p1401_p1 = scmp.lt.s32.totalorder %s1399_s8, %s1395_s4 }
  0xb4   :  { %p1402_p2 = por %p1401_p1, %p1400_p0 }
  0xb6   :  { %p1403_p3 = pnand %p1402_p2, %p1396_p13 }
  0xb8   :  { %1406 = shalt.err (!%p1403_p3)
}
  0xb9   :  { %152 = dma.hbm_to_vmem [thread:$0]  %s1821_s10, 16, %s150_s26, [#allocation18]  }
  0xba   :  { %1429 = dma.done.wait [#allocation3], 256  }
  0xbb   :  { %1430 = vsyncadd [#allocation3], 4294967040 }
  0xbc   :  { %1431 = dma.done.wait [#allocation6], 512  }
  0xbd   :  { %1432 = vsyncadd [#allocation6], 4294966784 }
  0xbe   :  { %1433 = dma.done.wait [#allocation9], 256  }
  0xbf   :  { %1434 = vsyncadd [#allocation9], 4294967040 }
  0xc0   :  { %1435 = dma.done.wait [#allocation12], 256  }
  0xc1   :  { %1436 = vsyncadd [#allocation12], 4294967040 }
  0xc2   :  { %1437 = dma.done.wait [#allocation15], 3104  }
  0xc3   :  { %1438 = vsyncadd [#allocation15], 4294964192 }
  0xc4   :  { %1439 = dma.done.wait [#allocation18], 1552  }
  0xc5   :  { %1440 = vsyncadd [#allocation18], 4294965744  ;;  %v1460_v0 = vmov 0.0   ;;  %vm1461_vm0 = vmmov 0   ;;  %v1724_v1 = vld [vmem:[#allocation2] sm:$0xff]  ;;  %v1726_v2 = vld [vmem:[#allocation2 + $0x8] sm:$0xff] }
  0xc6   :  { %951 = vmatprep.subr.bf16.mxu1 %v1460_v0  ;;  %953 = vmatprep.mubr.msk.bf16.mxu1 %vm1461_vm0, %v1460_v0  ;;  %v201_v3 = vpack.c.bf16 %v1726_v2, %v1724_v1  ;;  %v1730_v4 = vld [vmem:[#allocation8] sm:$0xff]   ;;  %v190_v6 = vld [vmem:[#allocation5 + $0x8] sm:$0xff]  ;;  %vm209_vm1 = vcmask 130048   ;;  %v191_v9 = vld [vmem:[#allocation7] sm:$0xff]  ;;  %s1462_s10 = smov 32   ;;  %vm417_vm2 = vcmask 261120  }
  0xc7   :  { %963 = vmatprep.subr.bf16.mxu0 %v1460_v0  ;;  %965 = vmatprep.mubr.msk.bf16.mxu0 %vm1461_vm0, %v1460_v0  ;;  %v189_v5 = vld [vmem:[#allocation5] sm:$0xff]  ;;  %v1164_v8 = vld [vmem:[#allocation10] sm:$0xff]   ;;  %v192_v10 = vld [vmem:[#allocation7 + $0x8] sm:$0xff]  ;;  %vm442_vm3 = vcmask 785408   ;;  %vm420_vm4 = vcmask 523264  }
  0xc8   :  { %534 = vrot.lane.b32.xlu1 %v189_v5, %s1447_s1  ;;  %952 = vmatpush3.bf16.msra.mxu1 %v201_v3  ;;  %v202_v7 = vpack.c.bf16 %v190_v6, %v189_v5  ;;  %v1741_v11 = vld [vmem:[#allocation11] sm:$0xff]   ;;  %v203_v12 = vpack.c.bf16 %v192_v10, %v191_v9  ;;  %v1163_v13 = vld [vmem:[#allocation13] sm:$0xff]   ;;  %v544_v14 = vld [vmem:[#allocation17] sm:$0xff] }
  0xc9   :  { %964 = vmatpush3.bf16.msra.mxu0 %v201_v3  ;;  %957 = vmatprep.subr.bf16.mxu1 %v1460_v0  ;;  %v545_v15 = vld [vmem:[#allocation17 + $0x8] sm:$0xff]  ;;  %v546_v16 = vld [vmem:[#allocation17 + $0x10] sm:$0xff]  ;;  %v547_v18 = vld [vmem:[#allocation17 + $0x18] sm:$0xff] }
  0xca   :  { %v1092_v17 = vpack.c.bf16 %v545_v15, %v544_v14  ;;  %v423_v19 = vld [vmem:[#allocation14] sm:$0xff]  ;;  %v424_v20 = vld [vmem:[#allocation14 + $0x8] sm:$0xff]  ;;  %v1096_v21 = vpack.c.bf16 %v547_v18, %v546_v16  ;;  %v425_v26 = vld [vmem:[#allocation14 + $0x10] sm:$0xff] }
  0xcb   :  { %954 = vmatmul.mubr.msk.bf16.vlgmr.msra.gmra.mrb[0].mxu1 %vm209_vm1, %v1730_v4  ;;  %v1068_v22 = vpack.c.bf16 %v424_v20, %v423_v19  ;;  %v548_v23 = vld [vmem:[#allocation17 + $0x20] sm:$0xff]  ;;  %v549_v24 = vld [vmem:[#allocation17 + $0x28] sm:$0xff]  ;;  %v426_v27 = vld [vmem:[#allocation14 + $0x18] sm:$0xff] }
  0xcc   :  { %536 = vrot.lane.b32.xlu1 %v190_v6, %s1447_s1  ;;  %958 = vmatpush3.bf16.msra.mxu1 %v202_v7  ;;  %v1100_v25 = vpack.c.bf16 %v549_v24, %v548_v23  ;;  %v550_v28 = vld [vmem:[#allocation17 + $0x30] sm:$0xff]  ;;  %v1072_v29 = vpack.c.bf16 %v426_v27, %v425_v26  ;;  %v551_v30 = vld [vmem:[#allocation17 + $0x38] sm:$0xff]  ;;  %v428_v33 = vld [vmem:[#allocation14 + $0x28] sm:$0xff] }
  0xcd   :  { %959 = vmatprep.mubr.msk.bf16.mxu1 %vm1461_vm0, %v1460_v0  ;;  %969 = vmatprep.subr.bf16.mxu1 %v1460_v0  ;;  %v1104_v31 = vpack.c.bf16 %v551_v30, %v550_v28  ;;  %v427_v32 = vld [vmem:[#allocation14 + $0x20] sm:$0xff]  ;;  %v553_v37 = vld [vmem:[#allocation17 + $0x48] sm:$0xff]  ;;  %v430_v45 = vld [vmem:[#allocation14 + $0x38] sm:$0xff] }
  0xce   :  { %966 = vmatmul.mubr.msk.bf16.vlgmr.msra.gmra.mrb[0].mxu0 %vm209_vm1, %v1164_v8  ;;  %1069 = vmatprep.subr.bf16.mxu0 %v1068_v22  ;;  %v552_v34 = vld [vmem:[#allocation17 + $0x40] sm:$0xff]  ;;  %v1076_v36 = vpack.c.bf16 %v428_v33, %v427_v32  ;;  %v429_v44 = vld [vmem:[#allocation14 + $0x30] sm:$0xff]  ;;  %v555_v49 = vld [vmem:[#allocation17 + $0x58] sm:$0xff] }
  0xcf   :  { %1071 = vmatpush3.bf16.msra.mxu0 %v1068_v22  ;;  %v1108_v39 = vpack.c.bf16 %v553_v37, %v552_v34  ;;  %v554_v46 = vld [vmem:[#allocation17 + $0x50] sm:$0xff]  ;;  %v1080_v48 = vpack.c.bf16 %v430_v45, %v429_v44  ;;  %v431_v52 = vld [vmem:[#allocation14 + $0x40] sm:$0xff]  ;;  %v432_v53 = vld [vmem:[#allocation14 + $0x48] sm:$0xff] }
  0xd0   :  { %1073 = vmatprep.subr.bf16.mxu0 %v1072_v29  ;;  %v1112_v51 = vpack.c.bf16 %v555_v49, %v554_v46  ;;  %v1084_v55 = vpack.c.bf16 %v432_v53, %v431_v52  ;;  %v433_v59 = vld [vmem:[#allocation14 + $0x50] sm:$0xff]  ;;  %v434_v60 = vld [vmem:[#allocation14 + $0x58] sm:$0xff]  ;;  %v754_v37 = vld [vmem:[#allocation14 + $0x68] sm:$0xff] }
  0xd1   :  { %v1088_v61 = vpack.c.bf16 %v434_v60, %v433_v59  ;;  %v759_v45 = vld [vmem:[#allocation14 + $0x90] sm:$0xff] }
  0xd2   :  { %v763_v49 = vld [vmem:[#allocation14 + $0xb0] sm:$0xff] }
  0xd3   :  { %960 = vmatmul.mubr.msk.bf16.vlgmr.msra.gmra.mrb[4].mxu1 %vm209_vm1, %v1741_v11  ;;  %1075 = vmatpush3.bf16.msra.mxu0 %v1072_v29  ;;  %v886_v29 = vld [vmem:[#allocation16] ss:$0 sm:$0xff] }
  0xd4   :  { %970 = vmatpush3.bf16.msra.mxu1 %v203_v12  ;;  %971 = vmatprep.mubr.msk.bf16.mxu1 %vm1461_vm0, %v1460_v0 }
  0xd5   :  { %1093 = vmatprep.subr.bf16.mxu1 %v1092_v17  ;;  %1077 = vmatprep.subr.bf16.mxu0 %v1076_v36 }
  0xd7   :  { %1079 = vmatpush3.bf16.msra.mxu0 %v1076_v36  ;;  %v753_v36 = vld [vmem:[#allocation14 + $0x60] sm:$0xff] }
  0xd8   :  { %1081 = vmatprep.subr.bf16.mxu0 %v1080_v48 }
  0xdb   :  { %972 = vmatmul.mubr.msk.bf16.vlgmr.msra.gmra.mrb[8].mxu1 %vm209_vm1, %v1163_v13  ;;  %1083 = vmatpush3.bf16.msra.mxu0 %v1080_v48  ;;  %v762_v48 = vld [vmem:[#allocation14 + $0xa8] sm:$0xff] }
  0xdc   :  { %1095 = vmatpush3.bf16.msra.mxu1 %v1092_v17  ;;  %1085 = vmatprep.subr.bf16.mxu0 %v1084_v55 }
  0xdd   :  { %1097 = vmatprep.subr.bf16.mxu1 %v1096_v21 }
  0xdf   :  { %1087 = vmatpush3.bf16.msra.mxu0 %v1084_v55 }
  0xe0   :  { %1099 = vmatpush3.bf16.msra.mxu1 %v1096_v21  ;;  %1089 = vmatprep.subr.bf16.mxu0 %v1088_v61  ;;  %v889_v21 = vld [vmem:[#allocation19] ss:$0 sm:$0xff] }
  0xe1   :  { %1101 = vmatprep.subr.bf16.mxu1 %v1100_v25 }
  0xe3   :  { %1091 = vmatpush3.bf16.msra.mxu0 %v1088_v61 }
  0xe4   :  { %1103 = vmatpush3.bf16.msra.mxu1 %v1100_v25  ;;  %1029 = vmatprep.subr.bf16.mxu0 %v1460_v0 }
  0xe5   :  { %1105 = vmatprep.subr.bf16.mxu1 %v1104_v31 }
  0xe8   :  { %1107 = vmatpush3.bf16.msra.mxu1 %v1104_v31 }
  0xe9   :  { %1109 = vmatprep.subr.bf16.mxu1 %v1108_v39 }
  0xec   :  { %1111 = vmatpush3.bf16.msra.mxu1 %v1108_v39  ;;  %v1116_v39 = vpack.c.bf16 %v754_v37, %v753_v36 }
  0xed   :  { %1113 = vmatprep.subr.bf16.mxu1 %v1112_v51 }
  0xf0   :  { %1115 = vmatpush3.bf16.msra.mxu1 %v1112_v51 }
  0xf1   :  { %1035 = vmatprep.subr.bf16.mxu1 %v1460_v0 }
 0x13a   :  { %v535_v6 = vpop.permute.xlu1 %534 }
 0x13e   :  { %v537_v7 = vpop.permute.xlu1 %536 }
 0x19e   :  { %v1748_v35 = vpop.f32.mrb[0].mxu1 }
 0x19f   :  { %v955_v38 = vpop.f32.mrb[1].mxu1 }
 0x1a0   :  { %v1750_v40 = vpop.f32.mrb[2].mxu1  ;;  %v755_v38 = vld [vmem:[#allocation14 + $0x70] sm:$0xff] }
 0x1a1   :  { %v345_v41 = vpop.f32.mrb[0].mxu0  ;;  %v956_v42 = vpop.f32.mrb[3].mxu1 }
 0x1a2   :  { %v967_v43 = vpop.f32.mrb[1].mxu0  ;;  %v757_v42 = vld [vmem:[#allocation14 + $0x80] sm:$0xff] }
 0x1a3   :  { %v348_v47 = vpop.f32.mrb[2].mxu0  ;;  %v758_v43 = vld [vmem:[#allocation14 + $0x88] sm:$0xff] }
 0x1a4   :  { %v968_v50 = vpop.f32.mrb[3].mxu0  ;;  %v1124_v44 = vpack.c.bf16 %v758_v43, %v757_v42 }
 0x1a5   :  { %v764_v50 = vld [vmem:[#allocation14 + $0xb8] sm:$0xff] }
 0x1a6   :  { %v296_v54 = vpop.f32.mrb[4].mxu1  ;;  %v1136_v51 = vpack.c.bf16 %v764_v50, %v763_v49 }
 0x1a7   :  { %v961_v56 = vpop.f32.mrb[5].mxu1 }
 0x1a8   :  { %v299_v57 = vpop.f32.mrb[6].mxu1 }
 0x1a9   :  { %405 = vrot.lane.b32.xlu1 %v299_v57, %s1462_s10  ;;  %v962_v58 = vpop.f32.mrb[7].mxu1 }
 0x1ad   :  { %413 = vrot.lane.b32.xlu1 %v1726_v2, %s1447_s1 }
 0x1ae   :  { %v394_v62 = vpop.f32.mrb[8].mxu1 }
 0x1af   :  { %526 = vrot.lane.b32.xlu0 %v394_v62, %s1462_s10  ;;  %v973_v63 = vpop.f32.mrb[9].mxu1 }
 0x1b0   :  { %v397_v3 = vpop.f32.mrb[10].mxu1 }
 0x1b1   :  { %v974_v5 = vpop.f32.mrb[11].mxu1 }
 0x1b3   :  { %528 = vrot.lane.b32.xlu0 %v397_v3, %s1462_s10 }
 0x1b7   :  { %403 = vrot.lane.b32.xlu0 %v296_v54, %s1462_s10 }
 0x1bb   :  { %411 = vrot.lane.b32.xlu0 %v1724_v1, %s1447_s1 }
 0x21b   :  { %v406_v12 = vpop.permute.xlu1 %405 }
 0x21c   :  { %v419_v18 = vsel %vm417_vm2, %v1750_v40, %v406_v12  ;;  %v756_v40 = vld [vmem:[#allocation14 + $0x78] sm:$0xff] }
 0x21f   :  { %v414_v15 = vpop.permute.xlu1 %413 }
 0x220   :  { %v422_v20 = vsel %vm420_vm4, %v419_v18, %v414_v15 }
 0x221   :  { %v527_v2 = vpop.permute.xlu0 %526 }
 0x222   :  { %v540_v8 = vsel %vm417_vm2, %v345_v41, %v527_v2  ;;  %v1120_v41 = vpack.c.bf16 %v756_v40, %v755_v38  ;;  %v894_v2 = vld [vmem:[#allocation16 + $0x1] ss:$0 sm:$0xff] }
 0x223   :  { %v542_v9 = vsel %vm420_vm4, %v540_v8, %v535_v6 }
 0x224   :  { %1026 = vmatprep.mubr.msk.f32.mxu1 %vm442_vm3, %v542_v9 }
 0x225   :  { %v529_v10 = vpop.permute.xlu0 %528 }
 0x226   :  { %v541_v13 = vsel %vm417_vm2, %v348_v47, %v529_v10  ;;  %v761_v47 = vld [vmem:[#allocation14 + $0xa0] sm:$0xff] }
 0x227   :  { %v543_v14 = vsel %vm420_vm4, %v541_v13, %v537_v7 }
 0x228   :  { %1027 = vmatmul.mubr.msk.f32.vlgmr.msra.gmra.mrb[12].mxu1 %vm442_vm3, %v543_v14 }
 0x229   :  { %v404_v1 = vpop.permute.xlu0 %403  ;;  %1037 = vmatprep.mubr.msk.bf16.mxu1 %vm1461_vm0, %v1460_v0 }
 0x22a   :  { %v418_v16 = vsel %vm417_vm2, %v1748_v35, %v404_v1 }
 0x22d   :  { %v412_v17 = vpop.permute.xlu0 %411 }
 0x22e   :  { %v421_v19 = vsel %vm420_vm4, %v418_v16, %v412_v17 }
 0x22f   :  { %999 = vmatprep.mubr.msk.f32.mxu0 %vm442_vm3, %v421_v19 }
 0x230   :  { %1000 = vmatmul.mubr.msk.f32.vlgmr.msra.gmra.mrb[4].mxu0 %vm442_vm3, %v422_v20 }
 0x231   :  { %1031 = vmatprep.mubr.msk.bf16.mxu0 %vm1461_vm0, %v1460_v0 }
 0x2fb   :  { %v1028_v22 = vpop.f32.mrb[12].mxu1 }
 0x2fc   :  { %v641_v23 = vadd.f32 %v1028_v22, %v889_v21  ;;  %v635_v24 = vpop.f32.mrb[13].mxu1 }
 0x2fd   :  { %v636_v25 = vadd.f32 %v889_v21, %v635_v24 }
 0x2fe   :  { %v647_v26 = vmax.f32 %v641_v23, 0.0 }
 0x2ff   :  { %v646_v27 = vmax.f32 %v636_v25, 0.0 }
 0x301   :  { %v649_v28 = vpack.c.bf16 %v647_v26, %v646_v27 }
 0x303   :  { %v1001_v30 = vpop.f32.mrb[4].mxu0  ;;  %1036 = vmatpush3.bf16.msra.mxu1 %v649_v28 }
 0x304   :  { %v521_v31 = vadd.f32 %v1001_v30, %v886_v29  ;;  %v515_v32 = vpop.f32.mrb[5].mxu0 }
 0x305   :  { %v516_v33 = vadd.f32 %v886_v29, %v515_v32 }
 0x306   :  { %v645_v34 = vmax.f32 %v521_v31, 0.0  ;;  %1038 = vmatmul.mubr.msk.bf16.vlgmr.msra.gmra.mrb[16].mxu1 %vm209_vm1, %v1741_v11  ;;  %v760_v11 = vld [vmem:[#allocation14 + $0x98] sm:$0xff] }
 0x307   :  { %v644_v35 = vmax.f32 %v516_v33, 0.0  ;;  %v1128_v46 = vpack.c.bf16 %v760_v11, %v759_v45 }
 0x309   :  { %v648_v0 = vpack.c.bf16 %v645_v34, %v644_v35 }
 0x30b   :  { %1030 = vmatpush3.bf16.msra.mxu0 %v648_v0 }
 0x30c   :  { %1117 = vmatprep.subr.bf16.mxu0 %v1116_v39 }
 0x30e   :  { %1032 = vmatmul.mubr.msk.bf16.vlgmr.msra.gmra.mrb[8].mxu0 %vm209_vm1, %v1730_v4  ;;  %v1132_v4 = vpack.c.bf16 %v762_v48, %v761_v47 }
 0x30f   :  { %1119 = vmatpush3.bf16.msra.mxu0 %v1116_v39 }
 0x310   :  { %1121 = vmatprep.subr.bf16.mxu0 %v1120_v41 }
 0x313   :  { %1123 = vmatpush3.bf16.msra.mxu0 %v1120_v41 }
 0x314   :  { %1125 = vmatprep.subr.bf16.mxu0 %v1124_v44 }
 0x317   :  { %1127 = vmatpush3.bf16.msra.mxu0 %v1124_v44 }
 0x318   :  { %1129 = vmatprep.subr.bf16.mxu0 %v1128_v46 }
 0x31b   :  { %1131 = vmatpush3.bf16.msra.mxu0 %v1128_v46 }
 0x31c   :  { %1133 = vmatprep.subr.bf16.mxu0 %v1132_v4 }
 0x31f   :  { %1135 = vmatpush3.bf16.msra.mxu0 %v1132_v4 }
 0x320   :  { %1137 = vmatprep.subr.bf16.mxu0 %v1136_v51 }
 0x323   :  { %1139 = vmatpush3.bf16.msra.mxu0 %v1136_v51 }
 0x3d9   :  { %v725_v52 = vpop.f32.mrb[16].mxu1 }
 0x3da   :  { %734 = vrot.lane.b32.xlu0 %v725_v52, %s1462_s10  ;;  %v1039_v53 = vpop.f32.mrb[17].mxu1 }
 0x3db   :  { %v728_v54 = vpop.f32.mrb[18].mxu1 }
 0x3dc   :  { %736 = vrot.lane.b32.xlu1 %v728_v54, %s1462_s10  ;;  %v1040_v55 = vpop.f32.mrb[19].mxu1 }
 0x3de   :  { %742 = vrot.lane.b32.xlu0 %v644_v35, %s1447_s1 }
 0x3e0   :  { %744 = vrot.lane.b32.xlu1 %v645_v34, %s1447_s1  ;;  %s1463_s1 = smov [#allocation20]  }
 0x3e1   :  { %v684_v56 = vpop.f32.mrb[8].mxu0  ;;  %s861_s5 = sshll.u32 %s1463_s1, 4  ;;  %s862_s5 = int_to_ptr.vmem [resolvable:$true] %s861_s5 }
 0x3e2   :  { %v1033_v57 = vpop.f32.mrb[9].mxu0  ;;  %s1407_s27 = scalar_lea.vmem %s862_s5, 256  ;;  %p1412_p5 = scmp.lt.s32.totalorder %s862_s5, %s862_s5 }
 0x3e3   :  { %v687_v58 = vpop.f32.mrb[10].mxu0  ;;  %p1408_p4 = scmp.ne.s32.totalorder %s862_s5, %s1407_s27  ;;  %p1413_p6 = scmp.lt.s32.totalorder %s1407_s27, %s1407_s27 }
 0x3e4   :  { %v1034_v59 = vpop.f32.mrb[11].mxu0 }
 0x3e5   :  { %p1414_p7 = por %p1413_p6, %p1412_p5 }
 0x3e7   :  { %p1415_p8 = pnand %p1414_p7, %p1408_p4 }
 0x44c   :  { %v735_v60 = vpop.permute.xlu0 %734 }
 0x44d   :  { %v748_v62 = vsel %vm417_vm2, %v684_v56, %v735_v60 }
 0x44e   :  { %v737_v61 = vpop.permute.xlu1 %736 }
 0x44f   :  { %v749_v5 = vsel %vm417_vm2, %v687_v58, %v737_v61 }
 0x450   :  { %v743_v63 = vpop.permute.xlu0 %742 }
 0x451   :  { %v750_v3 = vsel %vm420_vm4, %v748_v62, %v743_v63 }
 0x452   :  { %1065 = vmatprep.mubr.msk.f32.mxu0 %vm442_vm3, %v750_v3  ;;  %v745_v6 = vpop.permute.xlu1 %744 }
 0x453   :  { %v751_v7 = vsel %vm420_vm4, %v749_v5, %v745_v6 }
 0x454   :  { %1066 = vmatmul.mubr.msk.f32.vlgmr.msra.gmra.mrb[6].mxu0 %vm442_vm3, %v751_v7 }
 0x527   :  { %v1067_v8 = vpop.f32.mrb[6].mxu0 }
 0x528   :  { %v851_v9 = vadd.f32 %v1067_v8, %v894_v2  ;;  %v845_v10 = vpop.f32.mrb[7].mxu0 }
 0x529   :  { %v846_v12 = vadd.f32 %v894_v2, %v845_v10 }
 0x52a   :  { %855 = vst.msk [vmem:[#allocation20 + $0x8] sm:$0xff] %vm417_vm2, %v851_v9 }
 0x52b   :  { %854 = vst.msk [vmem:[#allocation20] sm:$0xff] %vm417_vm2, %v846_v12 }
 0x52c   :  { %1418 = shalt.err (!%p1415_p8)
}
 0x52d   :  { %s1419_s3 = scalar_lea.hbm %s1822_s11, 256 }
 0x52e   :  { %p1420_p9 = scmp.ne.s32.totalorder %s1822_s11, %s1419_s3  ;;  %p1423_p10 = scmp.lt.u32.totalorder %s1419_s3, %s1822_s11 }
 0x530   :  { %p1425_p11 = pnand %p1423_p10, %p1420_p9 }
 0x532   :  { %1428 = shalt.err (!%p1425_p11)
}
 0x533   :  { %867 = dma.vmem_to_hbm [thread:$0]  %s862_s5, 256, %s1822_s11, [#allocation4], %s1445_s29, %s1445_s29, %s1446_s30  }
 0x534   :  { %1441 = dma.done.wait [#allocation4], 256  }
 0x535   :  { %1442 = vsyncadd [#allocation4], 4294967040 }
 0x536   :  { %871 = vsyncpa [#allocation3], 1 }
 0x537   :  { %872 = vsyncpa [#allocation6], 1 }
 0x538   :  { %873 = vsyncpa [#allocation9], 1 }
 0x539   :  { %874 = vsyncpa [#allocation12], 1 }
 0x53a   :  { %875 = vsyncpa [#allocation15], 1 }
 0x53b   :  { %876 = vsyncpa [#allocation18], 1 }
 0x53c   :  { %877 = vsyncpa [#allocation4], 1 }

</bundles_post_ra>
